<compile_context>
chip_gen: v7x
topology: tpu7x:2x2x1
jax: 0.10.0
libtpu: 0.0.40
codegen_flags: <defaults>
</compile_context>

<pallas_src>
import jax
import jax.numpy as jnp
from jax.experimental import pallas as pl
from jax.experimental.pallas import tpu as pltpu

N_FEATURE = 16  # n_feature in the PyTorch module


def _vmem_specs(n):
    return [pl.BlockSpec(memory_space=pltpu.MemorySpace.VMEM) for _ in range(n)]


# ----------------------------------------------------------------------------
# Encoder kernel: rows [0:ni) are the left children, rows [ni:2ni) the right.
# The shared MLP (22 -> 16 -> 16 -> 16, ReLU between) runs once over all 2*ni
# rows, then the two halves are added:  out = W(cat(p_l,f_l)) + W(cat(p_r,f_r)).
# ----------------------------------------------------------------------------
def _encoder_kernel(x_ref, f_ref, w1, b1, w2, b2, w3, b3, out_ref):
    x = jnp.concatenate([x_ref[...], f_ref[...]], axis=1)          # (2ni, 22)
    h = jnp.maximum(jnp.dot(x, w1[...], preferred_element_type=jnp.float32) + b1[...], 0.0)
    h = jnp.maximum(jnp.dot(h, w2[...], preferred_element_type=jnp.float32) + b2[...], 0.0)
    h = jnp.dot(h, w3[...], preferred_element_type=jnp.float32) + b3[...]   # (2ni, 16)
    ni = out_ref.shape[0]
    out_ref[...] = h[:ni, :] + h[ni:, :]


def encoder_pallas(x_lr, f_lr, enc_params):
    ni = x_lr.shape[0] // 2
    args = (x_lr, f_lr) + tuple(enc_params)
    return pl.pallas_call(
        _encoder_kernel,
        out_shape=jax.ShapeDtypeStruct((ni, N_FEATURE), jnp.float32),
        in_specs=_vmem_specs(len(args)),
        out_specs=pl.BlockSpec(memory_space=pltpu.MemorySpace.VMEM),
    )(*args)


# ----------------------------------------------------------------------------
# Fused per-level decode kernel:
#   decoder MLP (22 -> 16 -> 32 -> 46) with static-slice tanh/sigmoid heads,
#   position loss (best left/right assignment) + BCE leaf loss (means in SMEM),
#   post-swap left/right features, and full 6-wide absolute-box rows for both
#   the ground-truth (X_ab) and reconstructed (X_ab_r) children.
# ----------------------------------------------------------------------------
def _decode_level_kernel(ff_ref, pf_ref, plgt_ref, prgt_ref, ll_ref, lr_ref,
                         absl_ref, absr_ref, absfa_ref, absrfa_ref,
                         w1, b1, w2, b2, w3, b3,
                         fL_ref, fR_ref, gabsL_ref, gabsR_ref,
                         rabsL_ref, rabsR_ref, loss_ref):
    nf = N_FEATURE

    # decoder MLP
    x = jnp.concatenate([ff_ref[...], pf_ref[...]], axis=1)        # (ni, 22)
    h = jnp.maximum(jnp.dot(x, w1[...], preferred_element_type=jnp.float32) + b1[...], 0.0)
    h = jnp.maximum(jnp.dot(h, w2[...], preferred_element_type=jnp.float32) + b2[...], 0.0)
    h = jnp.dot(h, w3[...], preferred_element_type=jnp.float32) + b3[...]   # (ni, 46)

    # static-slice activation heads (tanh on xy, sigmoid on s,w,h,a + isleaf)
    left_f = h[:, :nf]
    left_P = jnp.concatenate([jnp.tanh(h[:, nf:nf + 2]),
                              jax.nn.sigmoid(h[:, nf + 2:nf + 6])], axis=1)
    left_isleaf = jax.nn.sigmoid(h[:, nf + 6:nf + 7])
    right_f = h[:, nf + 7:2 * nf + 7]
    right_P = jnp.concatenate([jnp.tanh(h[:, 2 * nf + 7:2 * nf + 9]),
                               jax.nn.sigmoid(h[:, 2 * nf + 9:2 * nf + 13])], axis=1)
    right_isleaf = jax.nn.sigmoid(h[:, 2 * nf + 13:2 * nf + 14])

    # position loss with best left/right assignment (cal_distance2 / torch.min)
    def d2(q, p):  # MSE over xy + L1 over s,w,h,a  -> (ni, 1)
        dxy = jnp.sum((p[:, :2] - q[:, :2]) ** 2, axis=1, keepdims=True)
        dsw = jnp.sum(jnp.abs(p[:, 2:] - q[:, 2:]), axis=1, keepdims=True)
        return dxy + dsw

    p_l = plgt_ref[...]
    p_r = prgt_ref[...]
    l_l_r_r = d2(p_l, left_P) + d2(p_r, right_P)
    l_r_l_r = d2(p_l, right_P) + d2(p_r, left_P)
    swap = l_r_l_r < l_l_r_r                       # ties -> index 0 (torch.min)
    pos_loss = jnp.where(swap, l_r_l_r, l_l_r_r)   # (ni, 1)

    # BCE leaf loss (F.binary_cross_entropy, log clamped at -100)
    def bce(pred, tgt):
        return -(tgt * jnp.maximum(jnp.log(pred), -100.0)
                 + (1.0 - tgt) * jnp.maximum(jnp.log(1.0 - pred), -100.0))

    leaf_loss = bce(left_isleaf, ll_ref[...]) + bce(right_isleaf, lr_ref[...])

    ni = pos_loss.shape[0]
    inv_ni = 1.0 / ni
    loss_ref[0] = jnp.sum(pos_loss) * inv_ni       # mean position loss (SMEM scalar)
    loss_ref[1] = jnp.sum(leaf_loss) * inv_ni      # mean leaf loss     (SMEM scalar)

    # post-swap outputs
    out_p_left = jnp.where(swap, right_P, left_P)
    out_p_right = jnp.where(swap, left_P, right_P)
    fL_ref[...] = jnp.where(swap, right_f, left_f)
    fR_ref[...] = jnp.where(swap, left_f, right_f)

    # full 6-wide absolute-box rows: [xy*fa_s + fa_xy, s, wh*fa_wh, a]
    def abs_row(child, father):
        xy = child[:, :2] * father[:, 2:3] + father[:, :2]
        wh = child[:, 3:5] * father[:, 3:5]
        return jnp.concatenate([xy, child[:, 2:3], wh, child[:, 5:6]], axis=1)

    fa = absfa_ref[...]
    gabsL_ref[...] = abs_row(absl_ref[...], fa)        # ground-truth children
    gabsR_ref[...] = abs_row(absr_ref[...], fa)

    far = absrfa_ref[...]
    rabsL_ref[...] = abs_row(out_p_left, far)          # reconstructed children
    rabsR_ref[...] = abs_row(out_p_right, far)


def decode_level_pallas(f_father, p_father, p_left, p_right,
                        leaf_left, leaf_right,
                        abs_left, abs_right, abs_father, absr_father,
                        dec_params):
    ni = f_father.shape[0]
    args = (f_father, p_father, p_left, p_right, leaf_left, leaf_right,
            abs_left, abs_right, abs_father, absr_father) + tuple(dec_params)
    sd = jax.ShapeDtypeStruct
    out_shape = (sd((ni, N_FEATURE), jnp.float32),   # post-swap left features
                 sd((ni, N_FEATURE), jnp.float32),   # post-swap right features
                 sd((ni, 6), jnp.float32),           # gt absolute left row
                 sd((ni, 6), jnp.float32),           # gt absolute right row
                 sd((ni, 6), jnp.float32),           # recon absolute left row
                 sd((ni, 6), jnp.float32),           # recon absolute right row
                 sd((2,), jnp.float32))              # [pos_mean, leaf_mean] (SMEM)
    out_specs = tuple(_vmem_specs(6)) + (
        pl.BlockSpec(memory_space=pltpu.MemorySpace.SMEM),)
    return pl.pallas_call(
        _decode_level_kernel,
        out_shape=out_shape,
        in_specs=_vmem_specs(len(args)),
        out_specs=out_specs,
    )(*args)


# ----------------------------------------------------------------------------
# cal_distance_ab kernel:  MSE(mean) over xy + L1(mean) over s,w,h,a -> SMEM scalar
# ----------------------------------------------------------------------------
def _dist_ab_kernel(q_ref, p_ref, out_ref):
    q = q_ref[...]
    p = p_ref[...]
    n = q.shape[0]
    dxy = jnp.sum((p[:, :2] - q[:, :2]) ** 2)
    dsw = jnp.sum(jnp.abs(p[:, 2:] - q[:, 2:]))
    out_ref[0] = dxy * (1.0 / (n * 2)) + dsw * (1.0 / (n * 4))


def dist_ab_pallas(x_ab, x_ab_r):
    return pl.pallas_call(
        _dist_ab_kernel,
        out_shape=jax.ShapeDtypeStruct((1,), jnp.float32),
        in_specs=_vmem_specs(2),
        out_specs=pl.BlockSpec(memory_space=pltpu.MemorySpace.SMEM),
    )(x_ab, x_ab_r)


# ----------------------------------------------------------------------------
# Parameter init (deterministic, mirrors nn.Linear + xavier_uniform(relu gain))
# ----------------------------------------------------------------------------
def _linear_params(key, din, dout):
    kw, kb = jax.random.split(key)
    gain = float(jnp.sqrt(2.0))  # calculate_gain('relu')
    bound = gain * float(jnp.sqrt(6.0 / (din + dout)))
    w = jax.random.uniform(kw, (din, dout), jnp.float32, -bound, bound)
    bb = 1.0 / float(jnp.sqrt(din))
    b = jax.random.uniform(kb, (1, dout), jnp.float32, -bb, bb)
    return w, b


def init_params(key, nf=N_FEATURE):
    keys = jax.random.split(key, 6)
    enc_dims = [(nf + 6, nf), (nf, nf), (nf, nf)]
    dec_dims = [(nf + 6, nf), (nf, nf * 2), (nf * 2, (nf + 6 + 1) * 2)]
    enc, dec = [], []
    for k, (di, do) in zip(keys[:3], enc_dims):
        w, b = _linear_params(k, di, do)
        enc += [w, b]
    for k, (di, do) in zip(keys[3:], dec_dims):
        w, b = _linear_params(k, di, do)
        dec += [w, b]
    return tuple(enc), tuple(dec)


# ----------------------------------------------------------------------------
# AE.forward
# ----------------------------------------------------------------------------
def ae_forward(enc_params, dec_params, X, Feature, I_list, Node_is_leaf):
    X = X[0]                        # (n, 6)
    Feature = Feature[0]            # (n, nf)
    Node_is_leaf = Node_is_leaf[0]  # (n, 1)

    # ---- encode (bottom-up) ----
    Feature_New = Feature
    for item in I_list:
        I = item[0]
        idx_lr = jnp.concatenate([I[:, 0], I[:, 1]], axis=0)   # (2*ni,)
        out = encoder_pallas(X[idx_lr], Feature[idx_lr], enc_params)
        Feature_New = Feature_New.at[I[:, 2]].set(out)

    # ---- decode (top-down) ----
    X_ab = X
    X_ab_r = X
    Feat = Feature_New
    Loss_P = jnp.float32(0.0)
    Loss_Leaf = jnp.float32(0.0)
    num = 0
    num_I = len(I_list)
    for i in range(num_I):
        I = I_list[num_I - 1 - i][0]
        il, ir, ifa = I[:, 0], I[:, 1], I[:, 2]

        (fL, fR, gabsL, gabsR, rabsL, rabsR, losses) = decode_level_pallas(
            Feat[ifa], X[ifa], X[il], X[ir],
            Node_is_leaf[il], Node_is_leaf[ir],
            X_ab[il], X_ab[ir], X_ab[ifa], X_ab_r[ifa],
            dec_params)

        Loss_P = Loss_P + losses[0]
        Loss_Leaf = Loss_Leaf + losses[1]
        num += 1

        # one full-row scatter per side (fathers / children disjoint in a level)
        Feat = Feat.at[il].set(fL)
        Feat = Feat.at[ir].set(fR)
        X_ab = X_ab.at[il].set(gabsL)
        X_ab = X_ab.at[ir].set(gabsR)
        X_ab_r = X_ab_r.at[il].set(rabsL)
        X_ab_r = X_ab_r.at[ir].set(rabsR)

    Loss_ab = dist_ab_pallas(X_ab, X_ab_r)[0]
    Loss_P = Loss_P / num
    Loss_Leaf = Loss_Leaf / num
    Loss = Loss_ab + Loss_P + Loss_Leaf
    return Loss, Loss_ab, Loss_P, Loss_Leaf


if __name__ == "__main__":
    key = jax.random.PRNGKey(0)
    k_param, k_xy, k_swha, k_feat = jax.random.split(key, 4)
    enc_params, dec_params = init_params(k_param)

    # Small balanced binary tree: 7 nodes, leaves 0..3, internal 4,5, root 6.
    n = 7
    xy = jax.random.uniform(k_xy, (1, n, 2), jnp.float32, -1.0, 1.0)
    swha = jax.random.uniform(k_swha, (1, n, 4), jnp.float32, 0.1, 0.9)
    X = jnp.concatenate([xy, swha], axis=-1)                              # (1, 7, 6)
    Feature = jax.random.normal(k_feat, (1, n, N_FEATURE), jnp.float32)   # (1, 7, 16)
    Node_is_leaf = jnp.array([[[1.], [1.], [1.], [1.], [0.], [0.], [0.]]],
                             jnp.float32)                                 # (1, 7, 1)
    # I_list: nlevel * (B=1, ni, 3) with columns (left, right, father), bottom-up.
    I_list = (jnp.array([[[0, 1, 4], [2, 3, 5]]], jnp.int32),
              jnp.array([[[4, 5, 6]]], jnp.int32))

    fwd = jax.jit(ae_forward)
    loss, loss_ab, loss_p, loss_leaf = fwd(enc_params, dec_params,
                                           X, Feature, I_list, Node_is_leaf)
    jax.block_until_ready((loss, loss_ab, loss_p, loss_leaf))
    assert bool(jnp.isfinite(loss)), "non-finite loss"
    print("KERNEL_OK")
</pallas_src>

<mosaic_0001>
module attributes {stable_mosaic.version = 11 : i64} {
  func.func @_encoder_kernel(%arg0: memref<4x6xf32, #tpu.memory_space<vmem>>, %arg1: memref<4x16xf32, #tpu.memory_space<vmem>>, %arg2: memref<22x16xf32, #tpu.memory_space<vmem>>, %arg3: memref<1x16xf32, #tpu.memory_space<vmem>>, %arg4: memref<16x16xf32, #tpu.memory_space<vmem>>, %arg5: memref<1x16xf32, #tpu.memory_space<vmem>>, %arg6: memref<16x16xf32, #tpu.memory_space<vmem>>, %arg7: memref<1x16xf32, #tpu.memory_space<vmem>>, %arg8: memref<2x16xf32, #tpu.memory_space<vmem>>) attributes {dimension_semantics = [], scalar_prefetch = 0 : i64, scratch_operands = 0 : i64, tpu.core_type = #tpu.core_type<tc>} {
    %c0 = arith.constant 0 : index
    %c0_0 = arith.constant 0 : index
    %0 = vector.load %arg0[%c0, %c0_0] : memref<4x6xf32, #tpu.memory_space<vmem>>, vector<4x6xf32>
    %c0_1 = arith.constant 0 : index
    %c0_2 = arith.constant 0 : index
    %1 = vector.load %arg1[%c0_1, %c0_2] : memref<4x16xf32, #tpu.memory_space<vmem>>, vector<4x16xf32>
    %2 = tpu.concatenate %0, %1 in 1 : vector<4x6xf32>, vector<4x16xf32> -> vector<4x22xf32>
    %c0_3 = arith.constant 0 : index
    %c0_4 = arith.constant 0 : index
    %3 = vector.load %arg2[%c0_3, %c0_4] : memref<22x16xf32, #tpu.memory_space<vmem>>, vector<22x16xf32>
    %cst = arith.constant dense<0.000000e+00> : vector<4x16xf32>
    %4 = tpu.matmul %2, %3, %cst {dimension_numbers = #tpu.dot_dimension_numbers<[1], [0], [0], [1], [0, 0, 1, 1], [], []>} : vector<4x22xf32>, vector<22x16xf32>, vector<4x16xf32> -> vector<4x16xf32>
    %c0_5 = arith.constant 0 : index
    %c0_6 = arith.constant 0 : index
    %5 = vector.load %arg3[%c0_5, %c0_6] : memref<1x16xf32, #tpu.memory_space<vmem>>, vector<1x16xf32>
    %6 = vector.broadcast %5 : vector<1x16xf32> to vector<4x16xf32>
    %7 = arith.addf %4, %6 : vector<4x16xf32>
    %cst_7 = arith.constant 0.000000e+00 : f32
    %8 = vector.broadcast %cst_7 : f32 to vector<4x16xf32>
    %9 = arith.maximumf %7, %8 : vector<4x16xf32>
    %c0_8 = arith.constant 0 : index
    %c0_9 = arith.constant 0 : index
    %10 = vector.load %arg4[%c0_8, %c0_9] : memref<16x16xf32, #tpu.memory_space<vmem>>, vector<16x16xf32>
    %cst_10 = arith.constant dense<0.000000e+00> : vector<4x16xf32>
    %11 = tpu.matmul %9, %10, %cst_10 {dimension_numbers = #tpu.dot_dimension_numbers<[1], [0], [0], [1], [0, 0, 1, 1], [], []>} : vector<4x16xf32>, vector<16x16xf32>, vector<4x16xf32> -> vector<4x16xf32>
    %c0_11 = arith.constant 0 : index
    %c0_12 = arith.constant 0 : index
    %12 = vector.load %arg5[%c0_11, %c0_12] : memref<1x16xf32, #tpu.memory_space<vmem>>, vector<1x16xf32>
    %13 = vector.broadcast %12 : vector<1x16xf32> to vector<4x16xf32>
    %14 = arith.addf %11, %13 : vector<4x16xf32>
    %cst_13 = arith.constant 0.000000e+00 : f32
    %15 = vector.broadcast %cst_13 : f32 to vector<4x16xf32>
    %16 = arith.maximumf %14, %15 : vector<4x16xf32>
    %c0_14 = arith.constant 0 : index
    %c0_15 = arith.constant 0 : index
    %17 = vector.load %arg6[%c0_14, %c0_15] : memref<16x16xf32, #tpu.memory_space<vmem>>, vector<16x16xf32>
    %cst_16 = arith.constant dense<0.000000e+00> : vector<4x16xf32>
    %18 = tpu.matmul %16, %17, %cst_16 {dimension_numbers = #tpu.dot_dimension_numbers<[1], [0], [0], [1], [0, 0, 1, 1], [], []>} : vector<4x16xf32>, vector<16x16xf32>, vector<4x16xf32> -> vector<4x16xf32>
    %c0_17 = arith.constant 0 : index
    %c0_18 = arith.constant 0 : index
    %19 = vector.load %arg7[%c0_17, %c0_18] : memref<1x16xf32, #tpu.memory_space<vmem>>, vector<1x16xf32>
    %20 = vector.broadcast %19 : vector<1x16xf32> to vector<4x16xf32>
    %21 = arith.addf %18, %20 : vector<4x16xf32>
    %22 = vector.extract_strided_slice %21 {offsets = [0, 0], sizes = [2, 16], strides = [1, 1]} : vector<4x16xf32> to vector<2x16xf32>
    %23 = vector.extract_strided_slice %21 {offsets = [2, 0], sizes = [2, 16], strides = [1, 1]} : vector<4x16xf32> to vector<2x16xf32>
    %24 = arith.addf %22, %23 : vector<2x16xf32>
    %c0_19 = arith.constant 0 : index
    %c0_20 = arith.constant 0 : index
    %25 = vector.load %arg8[%c0_19, %c0_20] : memref<2x16xf32, #tpu.memory_space<vmem>>, vector<2x16xf32>
    tpu.vector_store %arg8[%c0_19, %c0_20], %24 {strides = array<i32>} : memref<2x16xf32, #tpu.memory_space<vmem>>, vector<2x16xf32>,
    return
  }
}

module attributes {stable_mosaic.version = 11 : i64} {
  func.func @_encoder_kernel(%arg0: memref<2x6xf32, #tpu.memory_space<vmem>>, %arg1: memref<2x16xf32, #tpu.memory_space<vmem>>, %arg2: memref<22x16xf32, #tpu.memory_space<vmem>>, %arg3: memref<1x16xf32, #tpu.memory_space<vmem>>, %arg4: memref<16x16xf32, #tpu.memory_space<vmem>>, %arg5: memref<1x16xf32, #tpu.memory_space<vmem>>, %arg6: memref<16x16xf32, #tpu.memory_space<vmem>>, %arg7: memref<1x16xf32, #tpu.memory_space<vmem>>, %arg8: memref<1x16xf32, #tpu.memory_space<vmem>>) attributes {dimension_semantics = [], scalar_prefetch = 0 : i64, scratch_operands = 0 : i64, tpu.core_type = #tpu.core_type<tc>} {
    %c0 = arith.constant 0 : index
    %c0_0 = arith.constant 0 : index
    %0 = vector.load %arg0[%c0, %c0_0] : memref<2x6xf32, #tpu.memory_space<vmem>>, vector<2x6xf32>
    %c0_1 = arith.constant 0 : index
    %c0_2 = arith.constant 0 : index
    %1 = vector.load %arg1[%c0_1, %c0_2] : memref<2x16xf32, #tpu.memory_space<vmem>>, vector<2x16xf32>
    %2 = tpu.concatenate %0, %1 in 1 : vector<2x6xf32>, vector<2x16xf32> -> vector<2x22xf32>
    %c0_3 = arith.constant 0 : index
    %c0_4 = arith.constant 0 : index
    %3 = vector.load %arg2[%c0_3, %c0_4] : memref<22x16xf32, #tpu.memory_space<vmem>>, vector<22x16xf32>
    %cst = arith.constant dense<0.000000e+00> : vector<2x16xf32>
    %4 = tpu.matmul %2, %3, %cst {dimension_numbers = #tpu.dot_dimension_numbers<[1], [0], [0], [1], [0, 0, 1, 1], [], []>} : vector<2x22xf32>, vector<22x16xf32>, vector<2x16xf32> -> vector<2x16xf32>
    %c0_5 = arith.constant 0 : index
    %c0_6 = arith.constant 0 : index
    %5 = vector.load %arg3[%c0_5, %c0_6] : memref<1x16xf32, #tpu.memory_space<vmem>>, vector<1x16xf32>
    %6 = vector.broadcast %5 : vector<1x16xf32> to vector<2x16xf32>
    %7 = arith.addf %4, %6 : vector<2x16xf32>
    %cst_7 = arith.constant 0.000000e+00 : f32
    %8 = vector.broadcast %cst_7 : f32 to vector<2x16xf32>
    %9 = arith.maximumf %7, %8 : vector<2x16xf32>
    %c0_8 = arith.constant 0 : index
    %c0_9 = arith.constant 0 : index
    %10 = vector.load %arg4[%c0_8, %c0_9] : memref<16x16xf32, #tpu.memory_space<vmem>>, vector<16x16xf32>
    %cst_10 = arith.constant dense<0.000000e+00> : vector<2x16xf32>
    %11 = tpu.matmul %9, %10, %cst_10 {dimension_numbers = #tpu.dot_dimension_numbers<[1], [0], [0], [1], [0, 0, 1, 1], [], []>} : vector<2x16xf32>, vector<16x16xf32>, vector<2x16xf32> -> vector<2x16xf32>
    %c0_11 = arith.constant 0 : index
    %c0_12 = arith.constant 0 : index
    %12 = vector.load %arg5[%c0_11, %c0_12] : memref<1x16xf32, #tpu.memory_space<vmem>>, vector<1x16xf32>
    %13 = vector.broadcast %12 : vector<1x16xf32> to vector<2x16xf32>
    %14 = arith.addf %11, %13 : vector<2x16xf32>
    %cst_13 = arith.constant 0.000000e+00 : f32
    %15 = vector.broadcast %cst_13 : f32 to vector<2x16xf32>
    %16 = arith.maximumf %14, %15 : vector<2x16xf32>
    %c0_14 = arith.constant 0 : index
    %c0_15 = arith.constant 0 : index
    %17 = vector.load %arg6[%c0_14, %c0_15] : memref<16x16xf32, #tpu.memory_space<vmem>>, vector<16x16xf32>
    %cst_16 = arith.constant dense<0.000000e+00> : vector<2x16xf32>
    %18 = tpu.matmul %16, %17, %cst_16 {dimension_numbers = #tpu.dot_dimension_numbers<[1], [0], [0], [1], [0, 0, 1, 1], [], []>} : vector<2x16xf32>, vector<16x16xf32>, vector<2x16xf32> -> vector<2x16xf32>
    %c0_17 = arith.constant 0 : index
    %c0_18 = arith.constant 0 : index
    %19 = vector.load %arg7[%c0_17, %c0_18] : memref<1x16xf32, #tpu.memory_space<vmem>>, vector<1x16xf32>
    %20 = vector.broadcast %19 : vector<1x16xf32> to vector<2x16xf32>
    %21 = arith.addf %18, %20 : vector<2x16xf32>
    %22 = vector.extract_strided_slice %21 {offsets = [0, 0], sizes = [1, 16], strides = [1, 1]} : vector<2x16xf32> to vector<1x16xf32>
    %23 = vector.extract_strided_slice %21 {offsets = [1, 0], sizes = [1, 16], strides = [1, 1]} : vector<2x16xf32> to vector<1x16xf32>
    %24 = arith.addf %22, %23 : vector<1x16xf32>
    %c0_19 = arith.constant 0 : index
    %c0_20 = arith.constant 0 : index
    %25 = vector.load %arg8[%c0_19, %c0_20] : memref<1x16xf32, #tpu.memory_space<vmem>>, vector<1x16xf32>
    tpu.vector_store %arg8[%c0_19, %c0_20], %24 {strides = array<i32>} : memref<1x16xf32, #tpu.memory_space<vmem>>, vector<1x16xf32>,
    return
  }
}

module attributes {stable_mosaic.version = 11 : i64} {
  func.func @_decode_level_kernel(%arg0: memref<1x16xf32, #tpu.memory_space<vmem>>, %arg1: memref<1x6xf32, #tpu.memory_space<vmem>>, %arg2: memref<1x6xf32, #tpu.memory_space<vmem>>, %arg3: memref<1x6xf32, #tpu.memory_space<vmem>>, %arg4: memref<1x1xf32, #tpu.memory_space<vmem>>, %arg5: memref<1x1xf32, #tpu.memory_space<vmem>>, %arg6: memref<1x6xf32, #tpu.memory_space<vmem>>, %arg7: memref<1x6xf32, #tpu.memory_space<vmem>>, %arg8: memref<1x6xf32, #tpu.memory_space<vmem>>, %arg9: memref<1x6xf32, #tpu.memory_space<vmem>>, %arg10: memref<22x16xf32, #tpu.memory_space<vmem>>, %arg11: memref<1x16xf32, #tpu.memory_space<vmem>>, %arg12: memref<16x32xf32, #tpu.memory_space<vmem>>, %arg13: memref<1x32xf32, #tpu.memory_space<vmem>>, %arg14: memref<32x46xf32, #tpu.memory_space<vmem>>, %arg15: memref<1x46xf32, #tpu.memory_space<vmem>>, %arg16: memref<1x16xf32, #tpu.memory_space<vmem>>, %arg17: memref<1x16xf32, #tpu.memory_space<vmem>>, %arg18: memref<1x6xf32, #tpu.memory_space<vmem>>, %arg19: memref<1x6xf32, #tpu.memory_space<vmem>>, %arg20: memref<1x6xf32, #tpu.memory_space<vmem>>, %arg21: memref<1x6xf32, #tpu.memory_space<vmem>>, %arg22: memref<2xf32, #tpu.memory_space<smem>>) attributes {dimension_semantics = [], scalar_prefetch = 0 : i64, scratch_operands = 0 : i64, tpu.core_type = #tpu.core_type<tc>} {
    %c0 = arith.constant 0 : index
    %c0_0 = arith.constant 0 : index
    %0 = vector.load %arg0[%c0, %c0_0] : memref<1x16xf32, #tpu.memory_space<vmem>>, vector<1x16xf32>
    %c0_1 = arith.constant 0 : index
    %c0_2 = arith.constant 0 : index
    %1 = vector.load %arg1[%c0_1, %c0_2] : memref<1x6xf32, #tpu.memory_space<vmem>>, vector<1x6xf32>
    %2 = tpu.concatenate %0, %1 in 1 : vector<1x16xf32>, vector<1x6xf32> -> vector<1x22xf32>
    %c0_3 = arith.constant 0 : index
    %c0_4 = arith.constant 0 : index
    %3 = vector.load %arg10[%c0_3, %c0_4] : memref<22x16xf32, #tpu.memory_space<vmem>>, vector<22x16xf32>
    %cst = arith.constant dense<0.000000e+00> : vector<1x16xf32>
    %4 = tpu.matmul %2, %3, %cst {dimension_numbers = #tpu.dot_dimension_numbers<[1], [0], [0], [1], [0, 0, 1, 1], [], []>} : vector<1x22xf32>, vector<22x16xf32>, vector<1x16xf32> -> vector<1x16xf32>
    %c0_5 = arith.constant 0 : index
    %c0_6 = arith.constant 0 : index
    %5 = vector.load %arg11[%c0_5, %c0_6] : memref<1x16xf32, #tpu.memory_space<vmem>>, vector<1x16xf32>
    %6 = arith.addf %4, %5 : vector<1x16xf32>
    %cst_7 = arith.constant 0.000000e+00 : f32
    %7 = vector.broadcast %cst_7 : f32 to vector<1x16xf32>
    %8 = arith.maximumf %6, %7 : vector<1x16xf32>
    %c0_8 = arith.constant 0 : index
    %c0_9 = arith.constant 0 : index
    %9 = vector.load %arg12[%c0_8, %c0_9] : memref<16x32xf32, #tpu.memory_space<vmem>>, vector<16x32xf32>
    %cst_10 = arith.constant dense<0.000000e+00> : vector<1x32xf32>
    %10 = tpu.matmul %8, %9, %cst_10 {dimension_numbers = #tpu.dot_dimension_numbers<[1], [0], [0], [1], [0, 0, 1, 1], [], []>} : vector<1x16xf32>, vector<16x32xf32>, vector<1x32xf32> -> vector<1x32xf32>
    %c0_11 = arith.constant 0 : index
    %c0_12 = arith.constant 0 : index
    %11 = vector.load %arg13[%c0_11, %c0_12] : memref<1x32xf32, #tpu.memory_space<vmem>>, vector<1x32xf32>
    %12 = arith.addf %10, %11 : vector<1x32xf32>
    %cst_13 = arith.constant 0.000000e+00 : f32
    %13 = vector.broadcast %cst_13 : f32 to vector<1x32xf32>
    %14 = arith.maximumf %12, %13 : vector<1x32xf32>
    %c0_14 = arith.constant 0 : index
    %c0_15 = arith.constant 0 : index
    %15 = vector.load %arg14[%c0_14, %c0_15] : memref<32x46xf32, #tpu.memory_space<vmem>>, vector<32x46xf32>
    %cst_16 = arith.constant dense<0.000000e+00> : vector<1x46xf32>
    %16 = tpu.matmul %14, %15, %cst_16 {dimension_numbers = #tpu.dot_dimension_numbers<[1], [0], [0], [1], [0, 0, 1, 1], [], []>} : vector<1x32xf32>, vector<32x46xf32>, vector<1x46xf32> -> vector<1x46xf32>
    %c0_17 = arith.constant 0 : index
    %c0_18 = arith.constant 0 : index
    %17 = vector.load %arg15[%c0_17, %c0_18] : memref<1x46xf32, #tpu.memory_space<vmem>>, vector<1x46xf32>
    %18 = arith.addf %16, %17 : vector<1x46xf32>
    %19 = vector.extract_strided_slice %18 {offsets = [0, 0], sizes = [1, 16], strides = [1, 1]} : vector<1x46xf32> to vector<1x16xf32>
    %20 = vector.extract_strided_slice %18 {offsets = [0, 16], sizes = [1, 2], strides = [1, 1]} : vector<1x46xf32> to vector<1x2xf32>
    %21 = math.tanh %20 : vector<1x2xf32>
    %22 = vector.extract_strided_slice %18 {offsets = [0, 18], sizes = [1, 4], strides = [1, 1]} : vector<1x46xf32> to vector<1x4xf32>
    %23 = arith.negf %22 : vector<1x4xf32>
    %24 = math.exp %23 : vector<1x4xf32>
    %cst_19 = arith.constant 1.000000e+00 : f32
    %25 = vector.broadcast %cst_19 : f32 to vector<1x4xf32>
    %26 = arith.addf %25, %24 : vector<1x4xf32>
    %27 = arith.divf %25, %26 : vector<1x4xf32>
    %28 = tpu.concatenate %21, %27 in 1 : vector<1x2xf32>, vector<1x4xf32> -> vector<1x6xf32>
    %29 = vector.extract_strided_slice %18 {offsets = [0, 22], sizes = [1, 1], strides = [1, 1]} : vector<1x46xf32> to vector<1x1xf32>
    %30 = arith.negf %29 : vector<1x1xf32>
    %31 = math.exp %30 : vector<1x1xf32>
    %cst_20 = arith.constant 1.000000e+00 : f32
    %32 = vector.broadcast %cst_20 : f32 to vector<1x1xf32>
    %33 = arith.addf %32, %31 : vector<1x1xf32>
    %34 = arith.divf %32, %33 : vector<1x1xf32>
    %35 = vector.extract_strided_slice %18 {offsets = [0, 23], sizes = [1, 16], strides = [1, 1]} : vector<1x46xf32> to vector<1x16xf32>
    %36 = vector.extract_strided_slice %18 {offsets = [0, 39], sizes = [1, 2], strides = [1, 1]} : vector<1x46xf32> to vector<1x2xf32>
    %37 = math.tanh %36 : vector<1x2xf32>
    %38 = vector.extract_strided_slice %18 {offsets = [0, 41], sizes = [1, 4], strides = [1, 1]} : vector<1x46xf32> to vector<1x4xf32>
    %39 = arith.negf %38 : vector<1x4xf32>
    %40 = math.exp %39 : vector<1x4xf32>
    %cst_21 = arith.constant 1.000000e+00 : f32
    %41 = vector.broadcast %cst_21 : f32 to vector<1x4xf32>
    %42 = arith.addf %41, %40 : vector<1x4xf32>
    %43 = arith.divf %41, %42 : vector<1x4xf32>
    %44 = tpu.concatenate %37, %43 in 1 : vector<1x2xf32>, vector<1x4xf32> -> vector<1x6xf32>
    %45 = vector.extract_strided_slice %18 {offsets = [0, 45], sizes = [1, 1], strides = [1, 1]} : vector<1x46xf32> to vector<1x1xf32>
    %46 = arith.negf %45 : vector<1x1xf32>
    %47 = math.exp %46 : vector<1x1xf32>
    %cst_22 = arith.constant 1.000000e+00 : f32
    %48 = vector.broadcast %cst_22 : f32 to vector<1x1xf32>
    %49 = arith.addf %48, %47 : vector<1x1xf32>
    %50 = arith.divf %48, %49 : vector<1x1xf32>
    %c0_23 = arith.constant 0 : index
    %c0_24 = arith.constant 0 : index
    %51 = vector.load %arg2[%c0_23, %c0_24] : memref<1x6xf32, #tpu.memory_space<vmem>>, vector<1x6xf32>
    %c0_25 = arith.constant 0 : index
    %c0_26 = arith.constant 0 : index
    %52 = vector.load %arg3[%c0_25, %c0_26] : memref<1x6xf32, #tpu.memory_space<vmem>>, vector<1x6xf32>
    %53 = vector.extract_strided_slice %28 {offsets = [0, 0], sizes = [1, 2], strides = [1, 1]} : vector<1x6xf32> to vector<1x2xf32>
    %54 = vector.extract_strided_slice %51 {offsets = [0, 0], sizes = [1, 2], strides = [1, 1]} : vector<1x6xf32> to vector<1x2xf32>
    %55 = arith.subf %53, %54 : vector<1x2xf32>
    %56 = arith.mulf %55, %55 : vector<1x2xf32>
    %cst_27 = arith.constant dense<0.000000e+00> : vector<1xf32>
    %57 = vector.multi_reduction <add>, %56, %cst_27 [1] : vector<1x2xf32> to vector<1xf32>
    %58 = vector.shape_cast %57 : vector<1xf32> to vector<1x1xf32>
    %59 = vector.extract_strided_slice %28 {offsets = [0, 2], sizes = [1, 4], strides = [1, 1]} : vector<1x6xf32> to vector<1x4xf32>
    %60 = vector.extract_strided_slice %51 {offsets = [0, 2], sizes = [1, 4], strides = [1, 1]} : vector<1x6xf32> to vector<1x4xf32>
    %61 = arith.subf %59, %60 : vector<1x4xf32>
    %62 = math.absf %61 : vector<1x4xf32>
    %cst_28 = arith.constant dense<0.000000e+00> : vector<1xf32>
    %63 = vector.multi_reduction <add>, %62, %cst_28 [1] : vector<1x4xf32> to vector<1xf32>
    %64 = vector.shape_cast %63 : vector<1xf32> to vector<1x1xf32>
    %65 = arith.addf %58, %64 : vector<1x1xf32>
    %66 = vector.extract_strided_slice %44 {offsets = [0, 0], sizes = [1, 2], strides = [1, 1]} : vector<1x6xf32> to vector<1x2xf32>
    %67 = vector.extract_strided_slice %52 {offsets = [0, 0], sizes = [1, 2], strides = [1, 1]} : vector<1x6xf32> to vector<1x2xf32>
    %68 = arith.subf %66, %67 : vector<1x2xf32>
    %69 = arith.mulf %68, %68 : vector<1x2xf32>
    %cst_29 = arith.constant dense<0.000000e+00> : vector<1xf32>
    %70 = vector.multi_reduction <add>, %69, %cst_29 [1] : vector<1x2xf32> to vector<1xf32>
    %71 = vector.shape_cast %70 : vector<1xf32> to vector<1x1xf32>
    %72 = vector.extract_strided_slice %44 {offsets = [0, 2], sizes = [1, 4], strides = [1, 1]} : vector<1x6xf32> to vector<1x4xf32>
    %73 = vector.extract_strided_slice %52 {offsets = [0, 2], sizes = [1, 4], strides = [1, 1]} : vector<1x6xf32> to vector<1x4xf32>
    %74 = arith.subf %72, %73 : vector<1x4xf32>
    %75 = math.absf %74 : vector<1x4xf32>
    %cst_30 = arith.constant dense<0.000000e+00> : vector<1xf32>
    %76 = vector.multi_reduction <add>, %75, %cst_30 [1] : vector<1x4xf32> to vector<1xf32>
    %77 = vector.shape_cast %76 : vector<1xf32> to vector<1x1xf32>
    %78 = arith.addf %71, %77 : vector<1x1xf32>
    %79 = arith.addf %65, %78 : vector<1x1xf32>
    %80 = vector.extract_strided_slice %44 {offsets = [0, 0], sizes = [1, 2], strides = [1, 1]} : vector<1x6xf32> to vector<1x2xf32>
    %81 = vector.extract_strided_slice %51 {offsets = [0, 0], sizes = [1, 2], strides = [1, 1]} : vector<1x6xf32> to vector<1x2xf32>
    %82 = arith.subf %80, %81 : vector<1x2xf32>
    %83 = arith.mulf %82, %82 : vector<1x2xf32>
    %cst_31 = arith.constant dense<0.000000e+00> : vector<1xf32>
    %84 = vector.multi_reduction <add>, %83, %cst_31 [1] : vector<1x2xf32> to vector<1xf32>
    %85 = vector.shape_cast %84 : vector<1xf32> to vector<1x1xf32>
    %86 = vector.extract_strided_slice %44 {offsets = [0, 2], sizes = [1, 4], strides = [1, 1]} : vector<1x6xf32> to vector<1x4xf32>
    %87 = vector.extract_strided_slice %51 {offsets = [0, 2], sizes = [1, 4], strides = [1, 1]} : vector<1x6xf32> to vector<1x4xf32>
    %88 = arith.subf %86, %87 : vector<1x4xf32>
    %89 = math.absf %88 : vector<1x4xf32>
    %cst_32 = arith.constant dense<0.000000e+00> : vector<1xf32>
    %90 = vector.multi_reduction <add>, %89, %cst_32 [1] : vector<1x4xf32> to vector<1xf32>
    %91 = vector.shape_cast %90 : vector<1xf32> to vector<1x1xf32>
    %92 = arith.addf %85, %91 : vector<1x1xf32>
    %93 = vector.extract_strided_slice %28 {offsets = [0, 0], sizes = [1, 2], strides = [1, 1]} : vector<1x6xf32> to vector<1x2xf32>
    %94 = vector.extract_strided_slice %52 {offsets = [0, 0], sizes = [1, 2], strides = [1, 1]} : vector<1x6xf32> to vector<1x2xf32>
    %95 = arith.subf %93, %94 : vector<1x2xf32>
    %96 = arith.mulf %95, %95 : vector<1x2xf32>
    %cst_33 = arith.constant dense<0.000000e+00> : vector<1xf32>
    %97 = vector.multi_reduction <add>, %96, %cst_33 [1] : vector<1x2xf32> to vector<1xf32>
    %98 = vector.shape_cast %97 : vector<1xf32> to vector<1x1xf32>
    %99 = vector.extract_strided_slice %28 {offsets = [0, 2], sizes = [1, 4], strides = [1, 1]} : vector<1x6xf32> to vector<1x4xf32>
    %100 = vector.extract_strided_slice %52 {offsets = [0, 2], sizes = [1, 4], strides = [1, 1]} : vector<1x6xf32> to vector<1x4xf32>
    %101 = arith.subf %99, %100 : vector<1x4xf32>
    %102 = math.absf %101 : vector<1x4xf32>
    %cst_34 = arith.constant dense<0.000000e+00> : vector<1xf32>
    %103 = vector.multi_reduction <add>, %102, %cst_34 [1] : vector<1x4xf32> to vector<1xf32>
    %104 = vector.shape_cast %103 : vector<1xf32> to vector<1x1xf32>
    %105 = arith.addf %98, %104 : vector<1x1xf32>
    %106 = arith.addf %92, %105 : vector<1x1xf32>
    %107 = arith.cmpf olt, %106, %79 : vector<1x1xf32>
    %108 = arith.select %107, %106, %79 : vector<1x1xi1>, vector<1x1xf32>
    %c0_35 = arith.constant 0 : index
    %c0_36 = arith.constant 0 : index
    %109 = vector.load %arg4[%c0_35, %c0_36] : memref<1x1xf32, #tpu.memory_space<vmem>>, vector<1x1xf32>
    %110 = math.log %34 : vector<1x1xf32>
    %cst_37 = arith.constant -1.000000e+02 : f32
    %111 = vector.broadcast %cst_37 : f32 to vector<1x1xf32>
    %112 = arith.maximumf %110, %111 : vector<1x1xf32>
    %113 = arith.mulf %109, %112 : vector<1x1xf32>
    %cst_38 = arith.constant 1.000000e+00 : f32
    %114 = vector.broadcast %cst_38 : f32 to vector<1x1xf32>
    %115 = arith.subf %114, %109 : vector<1x1xf32>
    %cst_39 = arith.constant 1.000000e+00 : f32
    %116 = vector.broadcast %cst_39 : f32 to vector<1x1xf32>
    %117 = arith.subf %116, %34 : vector<1x1xf32>
    %118 = math.log %117 : vector<1x1xf32>
    %cst_40 = arith.constant -1.000000e+02 : f32
    %119 = vector.broadcast %cst_40 : f32 to vector<1x1xf32>
    %120 = arith.maximumf %118, %119 : vector<1x1xf32>
    %121 = arith.mulf %115, %120 : vector<1x1xf32>
    %122 = arith.addf %113, %121 : vector<1x1xf32>
    %cst_41 = arith.constant 0.000000e+00 : f32
    %123 = vector.broadcast %cst_41 : f32 to vector<1x1xf32>
    %124 = arith.subf %123, %122 : vector<1x1xf32>
    %c0_42 = arith.constant 0 : index
    %c0_43 = arith.constant 0 : index
    %125 = vector.load %arg5[%c0_42, %c0_43] : memref<1x1xf32, #tpu.memory_space<vmem>>, vector<1x1xf32>
    %126 = math.log %50 : vector<1x1xf32>
    %cst_44 = arith.constant -1.000000e+02 : f32
    %127 = vector.broadcast %cst_44 : f32 to vector<1x1xf32>
    %128 = arith.maximumf %126, %127 : vector<1x1xf32>
    %129 = arith.mulf %125, %128 : vector<1x1xf32>
    %cst_45 = arith.constant 1.000000e+00 : f32
    %130 = vector.broadcast %cst_45 : f32 to vector<1x1xf32>
    %131 = arith.subf %130, %125 : vector<1x1xf32>
    %cst_46 = arith.constant 1.000000e+00 : f32
    %132 = vector.broadcast %cst_46 : f32 to vector<1x1xf32>
    %133 = arith.subf %132, %50 : vector<1x1xf32>
    %134 = math.log %133 : vector<1x1xf32>
    %cst_47 = arith.constant -1.000000e+02 : f32
    %135 = vector.broadcast %cst_47 : f32 to vector<1x1xf32>
    %136 = arith.maximumf %134, %135 : vector<1x1xf32>
    %137 = arith.mulf %131, %136 : vector<1x1xf32>
    %138 = arith.addf %129, %137 : vector<1x1xf32>
    %cst_48 = arith.constant 0.000000e+00 : f32
    %139 = vector.broadcast %cst_48 : f32 to vector<1x1xf32>
    %140 = arith.subf %139, %138 : vector<1x1xf32>
    %141 = arith.addf %124, %140 : vector<1x1xf32>
    %142 = vector.shape_cast %108 : vector<1x1xf32> to vector<1x1x1xf32>
    %cst_49 = arith.constant dense<0.000000e+00> : vector<1xf32>
    %143 = vector.multi_reduction <add>, %142, %cst_49 [1, 2] : vector<1x1x1xf32> to vector<1xf32>
    %144 = vector.shape_cast %143 : vector<1xf32> to vector<1x1x1xf32>
    %145 = vector.extract %144[0, 0, 0] : f32 from vector<1x1x1xf32>
    %cst_50 = arith.constant 1.000000e+00 : f32
    %146 = arith.mulf %145, %cst_50 : f32
    %c0_51 = arith.constant 0 : index
    %147 = memref.load %arg22[%c0_51] : memref<2xf32, #tpu.memory_space<smem>>
    memref.store %146, %arg22[%c0_51] : memref<2xf32, #tpu.memory_space<smem>>
    %148 = vector.shape_cast %141 : vector<1x1xf32> to vector<1x1x1xf32>
    %cst_52 = arith.constant dense<0.000000e+00> : vector<1xf32>
    %149 = vector.multi_reduction <add>, %148, %cst_52 [1, 2] : vector<1x1x1xf32> to vector<1xf32>
    %150 = vector.shape_cast %149 : vector<1xf32> to vector<1x1x1xf32>
    %151 = vector.extract %150[0, 0, 0] : f32 from vector<1x1x1xf32>
    %cst_53 = arith.constant 1.000000e+00 : f32
    %152 = arith.mulf %151, %cst_53 : f32
    %c1 = arith.constant 1 : index
    %153 = memref.load %arg22[%c1] : memref<2xf32, #tpu.memory_space<smem>>
    memref.store %152, %arg22[%c1] : memref<2xf32, #tpu.memory_space<smem>>
    %154 = vector.shape_cast %107 : vector<1x1xi1> to vector<1x1xi1>
    %155 = vector.broadcast %154 : vector<1x1xi1> to vector<1x6xi1>
    %156 = arith.select %155, %44, %28 : vector<1x6xi1>, vector<1x6xf32>
    %157 = vector.shape_cast %107 : vector<1x1xi1> to vector<1x1xi1>
    %158 = vector.broadcast %157 : vector<1x1xi1> to vector<1x6xi1>
    %159 = arith.select %158, %28, %44 : vector<1x6xi1>, vector<1x6xf32>
    %160 = vector.shape_cast %107 : vector<1x1xi1> to vector<1x1xi1>
    %161 = vector.broadcast %160 : vector<1x1xi1> to vector<1x16xi1>
    %162 = arith.select %161, %35, %19 : vector<1x16xi1>, vector<1x16xf32>
    %c0_54 = arith.constant 0 : index
    %c0_55 = arith.constant 0 : index
    %163 = vector.load %arg16[%c0_54, %c0_55] : memref<1x16xf32, #tpu.memory_space<vmem>>, vector<1x16xf32>
    tpu.vector_store %arg16[%c0_54, %c0_55], %162 {strides = array<i32>} : memref<1x16xf32, #tpu.memory_space<vmem>>, vector<1x16xf32>,
    %164 = vector.shape_cast %107 : vector<1x1xi1> to vector<1x1xi1>
    %165 = vector.broadcast %164 : vector<1x1xi1> to vector<1x16xi1>
    %166 = arith.select %165, %19, %35 : vector<1x16xi1>, vector<1x16xf32>
    %c0_56 = arith.constant 0 : index
    %c0_57 = arith.constant 0 : index
    %167 = vector.load %arg17[%c0_56, %c0_57] : memref<1x16xf32, #tpu.memory_space<vmem>>, vector<1x16xf32>
    tpu.vector_store %arg17[%c0_56, %c0_57], %166 {strides = array<i32>} : memref<1x16xf32, #tpu.memory_space<vmem>>, vector<1x16xf32>,
    %c0_58 = arith.constant 0 : index
    %c0_59 = arith.constant 0 : index
    %168 = vector.load %arg8[%c0_58, %c0_59] : memref<1x6xf32, #tpu.memory_space<vmem>>, vector<1x6xf32>
    %c0_60 = arith.constant 0 : index
    %c0_61 = arith.constant 0 : index
    %169 = vector.load %arg6[%c0_60, %c0_61] : memref<1x6xf32, #tpu.memory_space<vmem>>, vector<1x6xf32>
    %170 = vector.extract_strided_slice %169 {offsets = [0, 0], sizes = [1, 2], strides = [1, 1]} : vector<1x6xf32> to vector<1x2xf32>
    %171 = vector.extract_strided_slice %168 {offsets = [0, 2], sizes = [1, 1], strides = [1, 1]} : vector<1x6xf32> to vector<1x1xf32>
    %172 = vector.broadcast %171 : vector<1x1xf32> to vector<1x2xf32>
    %173 = arith.mulf %170, %172 : vector<1x2xf32>
    %174 = vector.extract_strided_slice %168 {offsets = [0, 0], sizes = [1, 2], strides = [1, 1]} : vector<1x6xf32> to vector<1x2xf32>
    %175 = arith.addf %173, %174 : vector<1x2xf32>
    %176 = vector.extract_strided_slice %169 {offsets = [0, 3], sizes = [1, 2], strides = [1, 1]} : vector<1x6xf32> to vector<1x2xf32>
    %177 = vector.extract_strided_slice %168 {offsets = [0, 3], sizes = [1, 2], strides = [1, 1]} : vector<1x6xf32> to vector<1x2xf32>
    %178 = arith.mulf %176, %177 : vector<1x2xf32>
    %179 = vector.extract_strided_slice %169 {offsets = [0, 2], sizes = [1, 1], strides = [1, 1]} : vector<1x6xf32> to vector<1x1xf32>
    %180 = vector.extract_strided_slice %169 {offsets = [0, 5], sizes = [1, 1], strides = [1, 1]} : vector<1x6xf32> to vector<1x1xf32>
    %181 = tpu.concatenate %175, %179, %178, %180 in 1 : vector<1x2xf32>, vector<1x1xf32>, vector<1x2xf32>, vector<1x1xf32> -> vector<1x6xf32>
    %c0_62 = arith.constant 0 : index
    %c0_63 = arith.constant 0 : index
    %182 = vector.load %arg18[%c0_62, %c0_63] : memref<1x6xf32, #tpu.memory_space<vmem>>, vector<1x6xf32>
    tpu.vector_store %arg18[%c0_62, %c0_63], %181 {strides = array<i32>} : memref<1x6xf32, #tpu.memory_space<vmem>>, vector<1x6xf32>,
    %c0_64 = arith.constant 0 : index
    %c0_65 = arith.constant 0 : index
    %183 = vector.load %arg7[%c0_64, %c0_65] : memref<1x6xf32, #tpu.memory_space<vmem>>, vector<1x6xf32>
    %184 = vector.extract_strided_slice %183 {offsets = [0, 0], sizes = [1, 2], strides = [1, 1]} : vector<1x6xf32> to vector<1x2xf32>
    %185 = vector.extract_strided_slice %168 {offsets = [0, 2], sizes = [1, 1], strides = [1, 1]} : vector<1x6xf32> to vector<1x1xf32>
    %186 = vector.broadcast %185 : vector<1x1xf32> to vector<1x2xf32>
    %187 = arith.mulf %184, %186 : vector<1x2xf32>
    %188 = vector.extract_strided_slice %168 {offsets = [0, 0], sizes = [1, 2], strides = [1, 1]} : vector<1x6xf32> to vector<1x2xf32>
    %189 = arith.addf %187, %188 : vector<1x2xf32>
    %190 = vector.extract_strided_slice %183 {offsets = [0, 3], sizes = [1, 2], strides = [1, 1]} : vector<1x6xf32> to vector<1x2xf32>
    %191 = vector.extract_strided_slice %168 {offsets = [0, 3], sizes = [1, 2], strides = [1, 1]} : vector<1x6xf32> to vector<1x2xf32>
    %192 = arith.mulf %190, %191 : vector<1x2xf32>
    %193 = vector.extract_strided_slice %183 {offsets = [0, 2], sizes = [1, 1], strides = [1, 1]} : vector<1x6xf32> to vector<1x1xf32>
    %194 = vector.extract_strided_slice %183 {offsets = [0, 5], sizes = [1, 1], strides = [1, 1]} : vector<1x6xf32> to vector<1x1xf32>
    %195 = tpu.concatenate %189, %193, %192, %194 in 1 : vector<1x2xf32>, vector<1x1xf32>, vector<1x2xf32>, vector<1x1xf32> -> vector<1x6xf32>
    %c0_66 = arith.constant 0 : index
    %c0_67 = arith.constant 0 : index
    %196 = vector.load %arg19[%c0_66, %c0_67] : memref<1x6xf32, #tpu.memory_space<vmem>>, vector<1x6xf32>
    tpu.vector_store %arg19[%c0_66, %c0_67], %195 {strides = array<i32>} : memref<1x6xf32, #tpu.memory_space<vmem>>, vector<1x6xf32>,
    %c0_68 = arith.constant 0 : index
    %c0_69 = arith.constant 0 : index
    %197 = vector.load %arg9[%c0_68, %c0_69] : memref<1x6xf32, #tpu.memory_space<vmem>>, vector<1x6xf32>
    %198 = vector.extract_strided_slice %156 {offsets = [0, 0], sizes = [1, 2], strides = [1, 1]} : vector<1x6xf32> to vector<1x2xf32>
    %199 = vector.extract_strided_slice %197 {offsets = [0, 2], sizes = [1, 1], strides = [1, 1]} : vector<1x6xf32> to vector<1x1xf32>
    %200 = vector.broadcast %199 : vector<1x1xf32> to vector<1x2xf32>
    %201 = arith.mulf %198, %200 : vector<1x2xf32>
    %202 = vector.extract_strided_slice %197 {offsets = [0, 0], sizes = [1, 2], strides = [1, 1]} : vector<1x6xf32> to vector<1x2xf32>
    %203 = arith.addf %201, %202 : vector<1x2xf32>
    %204 = vector.extract_strided_slice %156 {offsets = [0, 3], sizes = [1, 2], strides = [1, 1]} : vector<1x6xf32> to vector<1x2xf32>
    %205 = vector.extract_strided_slice %197 {offsets = [0, 3], sizes = [1, 2], strides = [1, 1]} : vector<1x6xf32> to vector<1x2xf32>
    %206 = arith.mulf %204, %205 : vector<1x2xf32>
    %207 = vector.extract_strided_slice %156 {offsets = [0, 2], sizes = [1, 1], strides = [1, 1]} : vector<1x6xf32> to vector<1x1xf32>
    %208 = vector.extract_strided_slice %156 {offsets = [0, 5], sizes = [1, 1], strides = [1, 1]} : vector<1x6xf32> to vector<1x1xf32>
    %209 = tpu.concatenate %203, %207, %206, %208 in 1 : vector<1x2xf32>, vector<1x1xf32>, vector<1x2xf32>, vector<1x1xf32> -> vector<1x6xf32>
    %c0_70 = arith.constant 0 : index
    %c0_71 = arith.constant 0 : index
    %210 = vector.load %arg20[%c0_70, %c0_71] : memref<1x6xf32, #tpu.memory_space<vmem>>, vector<1x6xf32>
    tpu.vector_store %arg20[%c0_70, %c0_71], %209 {strides = array<i32>} : memref<1x6xf32, #tpu.memory_space<vmem>>, vector<1x6xf32>,
    %211 = vector.extract_strided_slice %159 {offsets = [0, 0], sizes = [1, 2], strides = [1, 1]} : vector<1x6xf32> to vector<1x2xf32>
    %212 = vector.extract_strided_slice %197 {offsets = [0, 2], sizes = [1, 1], strides = [1, 1]} : vector<1x6xf32> to vector<1x1xf32>
    %213 = vector.broadcast %212 : vector<1x1xf32> to vector<1x2xf32>
    %214 = arith.mulf %211, %213 : vector<1x2xf32>
    %215 = vector.extract_strided_slice %197 {offsets = [0, 0], sizes = [1, 2], strides = [1, 1]} : vector<1x6xf32> to vector<1x2xf32>
    %216 = arith.addf %214, %215 : vector<1x2xf32>
    %217 = vector.extract_strided_slice %159 {offsets = [0, 3], sizes = [1, 2], strides = [1, 1]} : vector<1x6xf32> to vector<1x2xf32>
    %218 = vector.extract_strided_slice %197 {offsets = [0, 3], sizes = [1, 2], strides = [1, 1]} : vector<1x6xf32> to vector<1x2xf32>
    %219 = arith.mulf %217, %218 : vector<1x2xf32>
    %220 = vector.extract_strided_slice %159 {offsets = [0, 2], sizes = [1, 1], strides = [1, 1]} : vector<1x6xf32> to vector<1x1xf32>
    %221 = vector.extract_strided_slice %159 {offsets = [0, 5], sizes = [1, 1], strides = [1, 1]} : vector<1x6xf32> to vector<1x1xf32>
    %222 = tpu.concatenate %216, %220, %219, %221 in 1 : vector<1x2xf32>, vector<1x1xf32>, vector<1x2xf32>, vector<1x1xf32> -> vector<1x6xf32>
    %c0_72 = arith.constant 0 : index
    %c0_73 = arith.constant 0 : index
    %223 = vector.load %arg21[%c0_72, %c0_73] : memref<1x6xf32, #tpu.memory_space<vmem>>, vector<1x6xf32>
    tpu.vector_store %arg21[%c0_72, %c0_73], %222 {strides = array<i32>} : memref<1x6xf32, #tpu.memory_space<vmem>>, vector<1x6xf32>,
    return
  }
}

module attributes {stable_mosaic.version = 11 : i64} {
  func.func @_dist_ab_kernel(%arg0: memref<7x6xf32, #tpu.memory_space<vmem>>, %arg1: memref<7x6xf32, #tpu.memory_space<vmem>>, %arg2: memref<1xf32, #tpu.memory_space<smem>>) attributes {dimension_semantics = [], scalar_prefetch = 0 : i64, scratch_operands = 0 : i64, tpu.core_type = #tpu.core_type<tc>} {
    %c0 = arith.constant 0 : index
    %c0_0 = arith.constant 0 : index
    %0 = vector.load %arg0[%c0, %c0_0] : memref<7x6xf32, #tpu.memory_space<vmem>>, vector<7x6xf32>
    %c0_1 = arith.constant 0 : index
    %c0_2 = arith.constant 0 : index
    %1 = vector.load %arg1[%c0_1, %c0_2] : memref<7x6xf32, #tpu.memory_space<vmem>>, vector<7x6xf32>
    %2 = vector.extract_strided_slice %1 {offsets = [0, 0], sizes = [7, 2], strides = [1, 1]} : vector<7x6xf32> to vector<7x2xf32>
    %3 = vector.extract_strided_slice %0 {offsets = [0, 0], sizes = [7, 2], strides = [1, 1]} : vector<7x6xf32> to vector<7x2xf32>
    %4 = arith.subf %2, %3 : vector<7x2xf32>
    %5 = arith.mulf %4, %4 : vector<7x2xf32>
    %6 = vector.shape_cast %5 : vector<7x2xf32> to vector<1x7x2xf32>
    %cst = arith.constant dense<0.000000e+00> : vector<1xf32>
    %7 = vector.multi_reduction <add>, %6, %cst [1, 2] : vector<1x7x2xf32> to vector<1xf32>
    %8 = vector.shape_cast %7 : vector<1xf32> to vector<1x1x1xf32>
    %9 = vector.extract %8[0, 0, 0] : f32 from vector<1x1x1xf32>
    %10 = vector.extract_strided_slice %1 {offsets = [0, 2], sizes = [7, 4], strides = [1, 1]} : vector<7x6xf32> to vector<7x4xf32>
    %11 = vector.extract_strided_slice %0 {offsets = [0, 2], sizes = [7, 4], strides = [1, 1]} : vector<7x6xf32> to vector<7x4xf32>
    %12 = arith.subf %10, %11 : vector<7x4xf32>
    %13 = math.absf %12 : vector<7x4xf32>
    %14 = vector.shape_cast %13 : vector<7x4xf32> to vector<1x7x4xf32>
    %cst_3 = arith.constant dense<0.000000e+00> : vector<1xf32>
    %15 = vector.multi_reduction <add>, %14, %cst_3 [1, 2] : vector<1x7x4xf32> to vector<1xf32>
    %16 = vector.shape_cast %15 : vector<1xf32> to vector<1x1x1xf32>
    %17 = vector.extract %16[0, 0, 0] : f32 from vector<1x1x1xf32>
    %cst_4 = arith.constant 0.0714285746 : f32
    %18 = arith.mulf %9, %cst_4 : f32
    %cst_5 = arith.constant 0.0357142873 : f32
    %19 = arith.mulf %17, %cst_5 : f32
    %20 = arith.addf %18, %19 : f32
    %c0_6 = arith.constant 0 : index
    %21 = memref.load %arg2[%c0_6] : memref<1xf32, #tpu.memory_space<smem>>
    memref.store %20, %arg2[%c0_6] : memref<1xf32, #tpu.memory_space<smem>>
    return
  }
}

module attributes {stable_mosaic.version = 11 : i64} {
  func.func @_decode_level_kernel(%arg0: memref<2x16xf32, #tpu.memory_space<vmem>>, %arg1: memref<2x6xf32, #tpu.memory_space<vmem>>, %arg2: memref<2x6xf32, #tpu.memory_space<vmem>>, %arg3: memref<2x6xf32, #tpu.memory_space<vmem>>, %arg4: memref<2x1xf32, #tpu.memory_space<vmem>>, %arg5: memref<2x1xf32, #tpu.memory_space<vmem>>, %arg6: memref<2x6xf32, #tpu.memory_space<vmem>>, %arg7: memref<2x6xf32, #tpu.memory_space<vmem>>, %arg8: memref<2x6xf32, #tpu.memory_space<vmem>>, %arg9: memref<2x6xf32, #tpu.memory_space<vmem>>, %arg10: memref<22x16xf32, #tpu.memory_space<vmem>>, %arg11: memref<1x16xf32, #tpu.memory_space<vmem>>, %arg12: memref<16x32xf32, #tpu.memory_space<vmem>>, %arg13: memref<1x32xf32, #tpu.memory_space<vmem>>, %arg14: memref<32x46xf32, #tpu.memory_space<vmem>>, %arg15: memref<1x46xf32, #tpu.memory_space<vmem>>, %arg16: memref<2x16xf32, #tpu.memory_space<vmem>>, %arg17: memref<2x16xf32, #tpu.memory_space<vmem>>, %arg18: memref<2x6xf32, #tpu.memory_space<vmem>>, %arg19: memref<2x6xf32, #tpu.memory_space<vmem>>, %arg20: memref<2x6xf32, #tpu.memory_space<vmem>>, %arg21: memref<2x6xf32, #tpu.memory_space<vmem>>, %arg22: memref<2xf32, #tpu.memory_space<smem>>) attributes {dimension_semantics = [], scalar_prefetch = 0 : i64, scratch_operands = 0 : i64, tpu.core_type = #tpu.core_type<tc>} {
    %c0 = arith.constant 0 : index
    %c0_0 = arith.constant 0 : index
    %0 = vector.load %arg0[%c0, %c0_0] : memref<2x16xf32, #tpu.memory_space<vmem>>, vector<2x16xf32>
    %c0_1 = arith.constant 0 : index
    %c0_2 = arith.constant 0 : index
    %1 = vector.load %arg1[%c0_1, %c0_2] : memref<2x6xf32, #tpu.memory_space<vmem>>, vector<2x6xf32>
    %2 = tpu.concatenate %0, %1 in 1 : vector<2x16xf32>, vector<2x6xf32> -> vector<2x22xf32>
    %c0_3 = arith.constant 0 : index
    %c0_4 = arith.constant 0 : index
    %3 = vector.load %arg10[%c0_3, %c0_4] : memref<22x16xf32, #tpu.memory_space<vmem>>, vector<22x16xf32>
    %cst = arith.constant dense<0.000000e+00> : vector<2x16xf32>
    %4 = tpu.matmul %2, %3, %cst {dimension_numbers = #tpu.dot_dimension_numbers<[1], [0], [0], [1], [0, 0, 1, 1], [], []>} : vector<2x22xf32>, vector<22x16xf32>, vector<2x16xf32> -> vector<2x16xf32>
    %c0_5 = arith.constant 0 : index
    %c0_6 = arith.constant 0 : index
    %5 = vector.load %arg11[%c0_5, %c0_6] : memref<1x16xf32, #tpu.memory_space<vmem>>, vector<1x16xf32>
    %6 = vector.broadcast %5 : vector<1x16xf32> to vector<2x16xf32>
    %7 = arith.addf %4, %6 : vector<2x16xf32>
    %cst_7 = arith.constant 0.000000e+00 : f32
    %8 = vector.broadcast %cst_7 : f32 to vector<2x16xf32>
    %9 = arith.maximumf %7, %8 : vector<2x16xf32>
    %c0_8 = arith.constant 0 : index
    %c0_9 = arith.constant 0 : index
    %10 = vector.load %arg12[%c0_8, %c0_9] : memref<16x32xf32, #tpu.memory_space<vmem>>, vector<16x32xf32>
    %cst_10 = arith.constant dense<0.000000e+00> : vector<2x32xf32>
    %11 = tpu.matmul %9, %10, %cst_10 {dimension_numbers = #tpu.dot_dimension_numbers<[1], [0], [0], [1], [0, 0, 1, 1], [], []>} : vector<2x16xf32>, vector<16x32xf32>, vector<2x32xf32> -> vector<2x32xf32>
    %c0_11 = arith.constant 0 : index
    %c0_12 = arith.constant 0 : index
    %12 = vector.load %arg13[%c0_11, %c0_12] : memref<1x32xf32, #tpu.memory_space<vmem>>, vector<1x32xf32>
    %13 = vector.broadcast %12 : vector<1x32xf32> to vector<2x32xf32>
    %14 = arith.addf %11, %13 : vector<2x32xf32>
    %cst_13 = arith.constant 0.000000e+00 : f32
    %15 = vector.broadcast %cst_13 : f32 to vector<2x32xf32>
    %16 = arith.maximumf %14, %15 : vector<2x32xf32>
    %c0_14 = arith.constant 0 : index
    %c0_15 = arith.constant 0 : index
    %17 = vector.load %arg14[%c0_14, %c0_15] : memref<32x46xf32, #tpu.memory_space<vmem>>, vector<32x46xf32>
    %cst_16 = arith.constant dense<0.000000e+00> : vector<2x46xf32>
    %18 = tpu.matmul %16, %17, %cst_16 {dimension_numbers = #tpu.dot_dimension_numbers<[1], [0], [0], [1], [0, 0, 1, 1], [], []>} : vector<2x32xf32>, vector<32x46xf32>, vector<2x46xf32> -> vector<2x46xf32>
    %c0_17 = arith.constant 0 : index
    %c0_18 = arith.constant 0 : index
    %19 = vector.load %arg15[%c0_17, %c0_18] : memref<1x46xf32, #tpu.memory_space<vmem>>, vector<1x46xf32>
    %20 = vector.broadcast %19 : vector<1x46xf32> to vector<2x46xf32>
    %21 = arith.addf %18, %20 : vector<2x46xf32>
    %22 = vector.extract_strided_slice %21 {offsets = [0, 0], sizes = [2, 16], strides = [1, 1]} : vector<2x46xf32> to vector<2x16xf32>
    %23 = vector.extract_strided_slice %21 {offsets = [0, 16], sizes = [2, 2], strides = [1, 1]} : vector<2x46xf32> to vector<2x2xf32>
    %24 = math.tanh %23 : vector<2x2xf32>
    %25 = vector.extract_strided_slice %21 {offsets = [0, 18], sizes = [2, 4], strides = [1, 1]} : vector<2x46xf32> to vector<2x4xf32>
    %26 = arith.negf %25 : vector<2x4xf32>
    %27 = math.exp %26 : vector<2x4xf32>
    %cst_19 = arith.constant 1.000000e+00 : f32
    %28 = vector.broadcast %cst_19 : f32 to vector<2x4xf32>
    %29 = arith.addf %28, %27 : vector<2x4xf32>
    %30 = arith.divf %28, %29 : vector<2x4xf32>
    %31 = tpu.concatenate %24, %30 in 1 : vector<2x2xf32>, vector<2x4xf32> -> vector<2x6xf32>
    %32 = vector.extract_strided_slice %21 {offsets = [0, 22], sizes = [2, 1], strides = [1, 1]} : vector<2x46xf32> to vector<2x1xf32>
    %33 = arith.negf %32 : vector<2x1xf32>
    %34 = math.exp %33 : vector<2x1xf32>
    %cst_20 = arith.constant 1.000000e+00 : f32
    %35 = vector.broadcast %cst_20 : f32 to vector<2x1xf32>
    %36 = arith.addf %35, %34 : vector<2x1xf32>
    %37 = arith.divf %35, %36 : vector<2x1xf32>
    %38 = vector.extract_strided_slice %21 {offsets = [0, 23], sizes = [2, 16], strides = [1, 1]} : vector<2x46xf32> to vector<2x16xf32>
    %39 = vector.extract_strided_slice %21 {offsets = [0, 39], sizes = [2, 2], strides = [1, 1]} : vector<2x46xf32> to vector<2x2xf32>
    %40 = math.tanh %39 : vector<2x2xf32>
    %41 = vector.extract_strided_slice %21 {offsets = [0, 41], sizes = [2, 4], strides = [1, 1]} : vector<2x46xf32> to vector<2x4xf32>
    %42 = arith.negf %41 : vector<2x4xf32>
    %43 = math.exp %42 : vector<2x4xf32>
    %cst_21 = arith.constant 1.000000e+00 : f32
    %44 = vector.broadcast %cst_21 : f32 to vector<2x4xf32>
    %45 = arith.addf %44, %43 : vector<2x4xf32>
    %46 = arith.divf %44, %45 : vector<2x4xf32>
    %47 = tpu.concatenate %40, %46 in 1 : vector<2x2xf32>, vector<2x4xf32> -> vector<2x6xf32>
    %48 = vector.extract_strided_slice %21 {offsets = [0, 45], sizes = [2, 1], strides = [1, 1]} : vector<2x46xf32> to vector<2x1xf32>
    %49 = arith.negf %48 : vector<2x1xf32>
    %50 = math.exp %49 : vector<2x1xf32>
    %cst_22 = arith.constant 1.000000e+00 : f32
    %51 = vector.broadcast %cst_22 : f32 to vector<2x1xf32>
    %52 = arith.addf %51, %50 : vector<2x1xf32>
    %53 = arith.divf %51, %52 : vector<2x1xf32>
    %c0_23 = arith.constant 0 : index
    %c0_24 = arith.constant 0 : index
    %54 = vector.load %arg2[%c0_23, %c0_24] : memref<2x6xf32, #tpu.memory_space<vmem>>, vector<2x6xf32>
    %c0_25 = arith.constant 0 : index
    %c0_26 = arith.constant 0 : index
    %55 = vector.load %arg3[%c0_25, %c0_26] : memref<2x6xf32, #tpu.memory_space<vmem>>, vector<2x6xf32>
    %56 = vector.extract_strided_slice %31 {offsets = [0, 0], sizes = [2, 2], strides = [1, 1]} : vector<2x6xf32> to vector<2x2xf32>
    %57 = vector.extract_strided_slice %54 {offsets = [0, 0], sizes = [2, 2], strides = [1, 1]} : vector<2x6xf32> to vector<2x2xf32>
    %58 = arith.subf %56, %57 : vector<2x2xf32>
    %59 = arith.mulf %58, %58 : vector<2x2xf32>
    %cst_27 = arith.constant dense<0.000000e+00> : vector<2xf32>
    %60 = vector.multi_reduction <add>, %59, %cst_27 [1] : vector<2x2xf32> to vector<2xf32>
    %61 = vector.shape_cast %60 : vector<2xf32> to vector<2x1xf32>
    %62 = vector.extract_strided_slice %31 {offsets = [0, 2], sizes = [2, 4], strides = [1, 1]} : vector<2x6xf32> to vector<2x4xf32>
    %63 = vector.extract_strided_slice %54 {offsets = [0, 2], sizes = [2, 4], strides = [1, 1]} : vector<2x6xf32> to vector<2x4xf32>
    %64 = arith.subf %62, %63 : vector<2x4xf32>
    %65 = math.absf %64 : vector<2x4xf32>
    %cst_28 = arith.constant dense<0.000000e+00> : vector<2xf32>
    %66 = vector.multi_reduction <add>, %65, %cst_28 [1] : vector<2x4xf32> to vector<2xf32>
    %67 = vector.shape_cast %66 : vector<2xf32> to vector<2x1xf32>
    %68 = arith.addf %61, %67 : vector<2x1xf32>
    %69 = vector.extract_strided_slice %47 {offsets = [0, 0], sizes = [2, 2], strides = [1, 1]} : vector<2x6xf32> to vector<2x2xf32>
    %70 = vector.extract_strided_slice %55 {offsets = [0, 0], sizes = [2, 2], strides = [1, 1]} : vector<2x6xf32> to vector<2x2xf32>
    %71 = arith.subf %69, %70 : vector<2x2xf32>
    %72 = arith.mulf %71, %71 : vector<2x2xf32>
    %cst_29 = arith.constant dense<0.000000e+00> : vector<2xf32>
    %73 = vector.multi_reduction <add>, %72, %cst_29 [1] : vector<2x2xf32> to vector<2xf32>
    %74 = vector.shape_cast %73 : vector<2xf32> to vector<2x1xf32>
    %75 = vector.extract_strided_slice %47 {offsets = [0, 2], sizes = [2, 4], strides = [1, 1]} : vector<2x6xf32> to vector<2x4xf32>
    %76 = vector.extract_strided_slice %55 {offsets = [0, 2], sizes = [2, 4], strides = [1, 1]} : vector<2x6xf32> to vector<2x4xf32>
    %77 = arith.subf %75, %76 : vector<2x4xf32>
    %78 = math.absf %77 : vector<2x4xf32>
    %cst_30 = arith.constant dense<0.000000e+00> : vector<2xf32>
    %79 = vector.multi_reduction <add>, %78, %cst_30 [1] : vector<2x4xf32> to vector<2xf32>
    %80 = vector.shape_cast %79 : vector<2xf32> to vector<2x1xf32>
    %81 = arith.addf %74, %80 : vector<2x1xf32>
    %82 = arith.addf %68, %81 : vector<2x1xf32>
    %83 = vector.extract_strided_slice %47 {offsets = [0, 0], sizes = [2, 2], strides = [1, 1]} : vector<2x6xf32> to vector<2x2xf32>
    %84 = vector.extract_strided_slice %54 {offsets = [0, 0], sizes = [2, 2], strides = [1, 1]} : vector<2x6xf32> to vector<2x2xf32>
    %85 = arith.subf %83, %84 : vector<2x2xf32>
    %86 = arith.mulf %85, %85 : vector<2x2xf32>
    %cst_31 = arith.constant dense<0.000000e+00> : vector<2xf32>
    %87 = vector.multi_reduction <add>, %86, %cst_31 [1] : vector<2x2xf32> to vector<2xf32>
    %88 = vector.shape_cast %87 : vector<2xf32> to vector<2x1xf32>
    %89 = vector.extract_strided_slice %47 {offsets = [0, 2], sizes = [2, 4], strides = [1, 1]} : vector<2x6xf32> to vector<2x4xf32>
    %90 = vector.extract_strided_slice %54 {offsets = [0, 2], sizes = [2, 4], strides = [1, 1]} : vector<2x6xf32> to vector<2x4xf32>
    %91 = arith.subf %89, %90 : vector<2x4xf32>
    %92 = math.absf %91 : vector<2x4xf32>
    %cst_32 = arith.constant dense<0.000000e+00> : vector<2xf32>
    %93 = vector.multi_reduction <add>, %92, %cst_32 [1] : vector<2x4xf32> to vector<2xf32>
    %94 = vector.shape_cast %93 : vector<2xf32> to vector<2x1xf32>
    %95 = arith.addf %88, %94 : vector<2x1xf32>
    %96 = vector.extract_strided_slice %31 {offsets = [0, 0], sizes = [2, 2], strides = [1, 1]} : vector<2x6xf32> to vector<2x2xf32>
    %97 = vector.extract_strided_slice %55 {offsets = [0, 0], sizes = [2, 2], strides = [1, 1]} : vector<2x6xf32> to vector<2x2xf32>
    %98 = arith.subf %96, %97 : vector<2x2xf32>
    %99 = arith.mulf %98, %98 : vector<2x2xf32>
    %cst_33 = arith.constant dense<0.000000e+00> : vector<2xf32>
    %100 = vector.multi_reduction <add>, %99, %cst_33 [1] : vector<2x2xf32> to vector<2xf32>
    %101 = vector.shape_cast %100 : vector<2xf32> to vector<2x1xf32>
    %102 = vector.extract_strided_slice %31 {offsets = [0, 2], sizes = [2, 4], strides = [1, 1]} : vector<2x6xf32> to vector<2x4xf32>
    %103 = vector.extract_strided_slice %55 {offsets = [0, 2], sizes = [2, 4], strides = [1, 1]} : vector<2x6xf32> to vector<2x4xf32>
    %104 = arith.subf %102, %103 : vector<2x4xf32>
    %105 = math.absf %104 : vector<2x4xf32>
    %cst_34 = arith.constant dense<0.000000e+00> : vector<2xf32>
    %106 = vector.multi_reduction <add>, %105, %cst_34 [1] : vector<2x4xf32> to vector<2xf32>
    %107 = vector.shape_cast %106 : vector<2xf32> to vector<2x1xf32>
    %108 = arith.addf %101, %107 : vector<2x1xf32>
    %109 = arith.addf %95, %108 : vector<2x1xf32>
    %110 = arith.cmpf olt, %109, %82 : vector<2x1xf32>
    %111 = arith.select %110, %109, %82 : vector<2x1xi1>, vector<2x1xf32>
    %c0_35 = arith.constant 0 : index
    %c0_36 = arith.constant 0 : index
    %112 = vector.load %arg4[%c0_35, %c0_36] : memref<2x1xf32, #tpu.memory_space<vmem>>, vector<2x1xf32>
    %113 = math.log %37 : vector<2x1xf32>
    %cst_37 = arith.constant -1.000000e+02 : f32
    %114 = vector.broadcast %cst_37 : f32 to vector<2x1xf32>
    %115 = arith.maximumf %113, %114 : vector<2x1xf32>
    %116 = arith.mulf %112, %115 : vector<2x1xf32>
    %cst_38 = arith.constant 1.000000e+00 : f32
    %117 = vector.broadcast %cst_38 : f32 to vector<2x1xf32>
    %118 = arith.subf %117, %112 : vector<2x1xf32>
    %cst_39 = arith.constant 1.000000e+00 : f32
    %119 = vector.broadcast %cst_39 : f32 to vector<2x1xf32>
    %120 = arith.subf %119, %37 : vector<2x1xf32>
    %121 = math.log %120 : vector<2x1xf32>
    %cst_40 = arith.constant -1.000000e+02 : f32
    %122 = vector.broadcast %cst_40 : f32 to vector<2x1xf32>
    %123 = arith.maximumf %121, %122 : vector<2x1xf32>
    %124 = arith.mulf %118, %123 : vector<2x1xf32>
    %125 = arith.addf %116, %124 : vector<2x1xf32>
    %cst_41 = arith.constant 0.000000e+00 : f32
    %126 = vector.broadcast %cst_41 : f32 to vector<2x1xf32>
    %127 = arith.subf %126, %125 : vector<2x1xf32>
    %c0_42 = arith.constant 0 : index
    %c0_43 = arith.constant 0 : index
    %128 = vector.load %arg5[%c0_42, %c0_43] : memref<2x1xf32, #tpu.memory_space<vmem>>, vector<2x1xf32>
    %129 = math.log %53 : vector<2x1xf32>
    %cst_44 = arith.constant -1.000000e+02 : f32
    %130 = vector.broadcast %cst_44 : f32 to vector<2x1xf32>
    %131 = arith.maximumf %129, %130 : vector<2x1xf32>
    %132 = arith.mulf %128, %131 : vector<2x1xf32>
    %cst_45 = arith.constant 1.000000e+00 : f32
    %133 = vector.broadcast %cst_45 : f32 to vector<2x1xf32>
    %134 = arith.subf %133, %128 : vector<2x1xf32>
    %cst_46 = arith.constant 1.000000e+00 : f32
    %135 = vector.broadcast %cst_46 : f32 to vector<2x1xf32>
    %136 = arith.subf %135, %53 : vector<2x1xf32>
    %137 = math.log %136 : vector<2x1xf32>
    %cst_47 = arith.constant -1.000000e+02 : f32
    %138 = vector.broadcast %cst_47 : f32 to vector<2x1xf32>
    %139 = arith.maximumf %137, %138 : vector<2x1xf32>
    %140 = arith.mulf %134, %139 : vector<2x1xf32>
    %141 = arith.addf %132, %140 : vector<2x1xf32>
    %cst_48 = arith.constant 0.000000e+00 : f32
    %142 = vector.broadcast %cst_48 : f32 to vector<2x1xf32>
    %143 = arith.subf %142, %141 : vector<2x1xf32>
    %144 = arith.addf %127, %143 : vector<2x1xf32>
    %145 = vector.shape_cast %111 : vector<2x1xf32> to vector<1x2x1xf32>
    %cst_49 = arith.constant dense<0.000000e+00> : vector<1xf32>
    %146 = vector.multi_reduction <add>, %145, %cst_49 [1, 2] : vector<1x2x1xf32> to vector<1xf32>
    %147 = vector.shape_cast %146 : vector<1xf32> to vector<1x1x1xf32>
    %148 = vector.extract %147[0, 0, 0] : f32 from vector<1x1x1xf32>
    %cst_50 = arith.constant 5.000000e-01 : f32
    %149 = arith.mulf %148, %cst_50 : f32
    %c0_51 = arith.constant 0 : index
    %150 = memref.load %arg22[%c0_51] : memref<2xf32, #tpu.memory_space<smem>>
    memref.store %149, %arg22[%c0_51] : memref<2xf32, #tpu.memory_space<smem>>
    %151 = vector.shape_cast %144 : vector<2x1xf32> to vector<1x2x1xf32>
    %cst_52 = arith.constant dense<0.000000e+00> : vector<1xf32>
    %152 = vector.multi_reduction <add>, %151, %cst_52 [1, 2] : vector<1x2x1xf32> to vector<1xf32>
    %153 = vector.shape_cast %152 : vector<1xf32> to vector<1x1x1xf32>
    %154 = vector.extract %153[0, 0, 0] : f32 from vector<1x1x1xf32>
    %cst_53 = arith.constant 5.000000e-01 : f32
    %155 = arith.mulf %154, %cst_53 : f32
    %c1 = arith.constant 1 : index
    %156 = memref.load %arg22[%c1] : memref<2xf32, #tpu.memory_space<smem>>
    memref.store %155, %arg22[%c1] : memref<2xf32, #tpu.memory_space<smem>>
    %157 = vector.shape_cast %110 : vector<2x1xi1> to vector<2x1xi1>
    %158 = vector.broadcast %157 : vector<2x1xi1> to vector<2x6xi1>
    %159 = arith.select %158, %47, %31 : vector<2x6xi1>, vector<2x6xf32>
    %160 = vector.shape_cast %110 : vector<2x1xi1> to vector<2x1xi1>
    %161 = vector.broadcast %160 : vector<2x1xi1> to vector<2x6xi1>
    %162 = arith.select %161, %31, %47 : vector<2x6xi1>, vector<2x6xf32>
    %163 = vector.shape_cast %110 : vector<2x1xi1> to vector<2x1xi1>
    %164 = vector.broadcast %163 : vector<2x1xi1> to vector<2x16xi1>
    %165 = arith.select %164, %38, %22 : vector<2x16xi1>, vector<2x16xf32>
    %c0_54 = arith.constant 0 : index
    %c0_55 = arith.constant 0 : index
    %166 = vector.load %arg16[%c0_54, %c0_55] : memref<2x16xf32, #tpu.memory_space<vmem>>, vector<2x16xf32>
    tpu.vector_store %arg16[%c0_54, %c0_55], %165 {strides = array<i32>} : memref<2x16xf32, #tpu.memory_space<vmem>>, vector<2x16xf32>,
    %167 = vector.shape_cast %110 : vector<2x1xi1> to vector<2x1xi1>
    %168 = vector.broadcast %167 : vector<2x1xi1> to vector<2x16xi1>
    %169 = arith.select %168, %22, %38 : vector<2x16xi1>, vector<2x16xf32>
    %c0_56 = arith.constant 0 : index
    %c0_57 = arith.constant 0 : index
    %170 = vector.load %arg17[%c0_56, %c0_57] : memref<2x16xf32, #tpu.memory_space<vmem>>, vector<2x16xf32>
    tpu.vector_store %arg17[%c0_56, %c0_57], %169 {strides = array<i32>} : memref<2x16xf32, #tpu.memory_space<vmem>>, vector<2x16xf32>,
    %c0_58 = arith.constant 0 : index
    %c0_59 = arith.constant 0 : index
    %171 = vector.load %arg8[%c0_58, %c0_59] : memref<2x6xf32, #tpu.memory_space<vmem>>, vector<2x6xf32>
    %c0_60 = arith.constant 0 : index
    %c0_61 = arith.constant 0 : index
    %172 = vector.load %arg6[%c0_60, %c0_61] : memref<2x6xf32, #tpu.memory_space<vmem>>, vector<2x6xf32>
    %173 = vector.extract_strided_slice %172 {offsets = [0, 0], sizes = [2, 2], strides = [1, 1]} : vector<2x6xf32> to vector<2x2xf32>
    %174 = vector.extract_strided_slice %171 {offsets = [0, 2], sizes = [2, 1], strides = [1, 1]} : vector<2x6xf32> to vector<2x1xf32>
    %175 = vector.broadcast %174 : vector<2x1xf32> to vector<2x2xf32>
    %176 = arith.mulf %173, %175 : vector<2x2xf32>
    %177 = vector.extract_strided_slice %171 {offsets = [0, 0], sizes = [2, 2], strides = [1, 1]} : vector<2x6xf32> to vector<2x2xf32>
    %178 = arith.addf %176, %177 : vector<2x2xf32>
    %179 = vector.extract_strided_slice %172 {offsets = [0, 3], sizes = [2, 2], strides = [1, 1]} : vector<2x6xf32> to vector<2x2xf32>
    %180 = vector.extract_strided_slice %171 {offsets = [0, 3], sizes = [2, 2], strides = [1, 1]} : vector<2x6xf32> to vector<2x2xf32>
    %181 = arith.mulf %179, %180 : vector<2x2xf32>
    %182 = vector.extract_strided_slice %172 {offsets = [0, 2], sizes = [2, 1], strides = [1, 1]} : vector<2x6xf32> to vector<2x1xf32>
    %183 = vector.extract_strided_slice %172 {offsets = [0, 5], sizes = [2, 1], strides = [1, 1]} : vector<2x6xf32> to vector<2x1xf32>
    %184 = tpu.concatenate %178, %182, %181, %183 in 1 : vector<2x2xf32>, vector<2x1xf32>, vector<2x2xf32>, vector<2x1xf32> -> vector<2x6xf32>
    %c0_62 = arith.constant 0 : index
    %c0_63 = arith.constant 0 : index
    %185 = vector.load %arg18[%c0_62, %c0_63] : memref<2x6xf32, #tpu.memory_space<vmem>>, vector<2x6xf32>
    tpu.vector_store %arg18[%c0_62, %c0_63], %184 {strides = array<i32>} : memref<2x6xf32, #tpu.memory_space<vmem>>, vector<2x6xf32>,
    %c0_64 = arith.constant 0 : index
    %c0_65 = arith.constant 0 : index
    %186 = vector.load %arg7[%c0_64, %c0_65] : memref<2x6xf32, #tpu.memory_space<vmem>>, vector<2x6xf32>
    %187 = vector.extract_strided_slice %186 {offsets = [0, 0], sizes = [2, 2], strides = [1, 1]} : vector<2x6xf32> to vector<2x2xf32>
    %188 = vector.extract_strided_slice %171 {offsets = [0, 2], sizes = [2, 1], strides = [1, 1]} : vector<2x6xf32> to vector<2x1xf32>
    %189 = vector.broadcast %188 : vector<2x1xf32> to vector<2x2xf32>
    %190 = arith.mulf %187, %189 : vector<2x2xf32>
    %191 = vector.extract_strided_slice %171 {offsets = [0, 0], sizes = [2, 2], strides = [1, 1]} : vector<2x6xf32> to vector<2x2xf32>
    %192 = arith.addf %190, %191 : vector<2x2xf32>
    %193 = vector.extract_strided_slice %186 {offsets = [0, 3], sizes = [2, 2], strides = [1, 1]} : vector<2x6xf32> to vector<2x2xf32>
    %194 = vector.extract_strided_slice %171 {offsets = [0, 3], sizes = [2, 2], strides = [1, 1]} : vector<2x6xf32> to vector<2x2xf32>
    %195 = arith.mulf %193, %194 : vector<2x2xf32>
    %196 = vector.extract_strided_slice %186 {offsets = [0, 2], sizes = [2, 1], strides = [1, 1]} : vector<2x6xf32> to vector<2x1xf32>
    %197 = vector.extract_strided_slice %186 {offsets = [0, 5], sizes = [2, 1], strides = [1, 1]} : vector<2x6xf32> to vector<2x1xf32>
    %198 = tpu.concatenate %192, %196, %195, %197 in 1 : vector<2x2xf32>, vector<2x1xf32>, vector<2x2xf32>, vector<2x1xf32> -> vector<2x6xf32>
    %c0_66 = arith.constant 0 : index
    %c0_67 = arith.constant 0 : index
    %199 = vector.load %arg19[%c0_66, %c0_67] : memref<2x6xf32, #tpu.memory_space<vmem>>, vector<2x6xf32>
    tpu.vector_store %arg19[%c0_66, %c0_67], %198 {strides = array<i32>} : memref<2x6xf32, #tpu.memory_space<vmem>>, vector<2x6xf32>,
    %c0_68 = arith.constant 0 : index
    %c0_69 = arith.constant 0 : index
    %200 = vector.load %arg9[%c0_68, %c0_69] : memref<2x6xf32, #tpu.memory_space<vmem>>, vector<2x6xf32>
    %201 = vector.extract_strided_slice %159 {offsets = [0, 0], sizes = [2, 2], strides = [1, 1]} : vector<2x6xf32> to vector<2x2xf32>
    %202 = vector.extract_strided_slice %200 {offsets = [0, 2], sizes = [2, 1], strides = [1, 1]} : vector<2x6xf32> to vector<2x1xf32>
    %203 = vector.broadcast %202 : vector<2x1xf32> to vector<2x2xf32>
    %204 = arith.mulf %201, %203 : vector<2x2xf32>
    %205 = vector.extract_strided_slice %200 {offsets = [0, 0], sizes = [2, 2], strides = [1, 1]} : vector<2x6xf32> to vector<2x2xf32>
    %206 = arith.addf %204, %205 : vector<2x2xf32>
    %207 = vector.extract_strided_slice %159 {offsets = [0, 3], sizes = [2, 2], strides = [1, 1]} : vector<2x6xf32> to vector<2x2xf32>
    %208 = vector.extract_strided_slice %200 {offsets = [0, 3], sizes = [2, 2], strides = [1, 1]} : vector<2x6xf32> to vector<2x2xf32>
    %209 = arith.mulf %207, %208 : vector<2x2xf32>
    %210 = vector.extract_strided_slice %159 {offsets = [0, 2], sizes = [2, 1], strides = [1, 1]} : vector<2x6xf32> to vector<2x1xf32>
    %211 = vector.extract_strided_slice %159 {offsets = [0, 5], sizes = [2, 1], strides = [1, 1]} : vector<2x6xf32> to vector<2x1xf32>
    %212 = tpu.concatenate %206, %210, %209, %211 in 1 : vector<2x2xf32>, vector<2x1xf32>, vector<2x2xf32>, vector<2x1xf32> -> vector<2x6xf32>
    %c0_70 = arith.constant 0 : index
    %c0_71 = arith.constant 0 : index
    %213 = vector.load %arg20[%c0_70, %c0_71] : memref<2x6xf32, #tpu.memory_space<vmem>>, vector<2x6xf32>
    tpu.vector_store %arg20[%c0_70, %c0_71], %212 {strides = array<i32>} : memref<2x6xf32, #tpu.memory_space<vmem>>, vector<2x6xf32>,
    %214 = vector.extract_strided_slice %162 {offsets = [0, 0], sizes = [2, 2], strides = [1, 1]} : vector<2x6xf32> to vector<2x2xf32>
    %215 = vector.extract_strided_slice %200 {offsets = [0, 2], sizes = [2, 1], strides = [1, 1]} : vector<2x6xf32> to vector<2x1xf32>
    %216 = vector.broadcast %215 : vector<2x1xf32> to vector<2x2xf32>
    %217 = arith.mulf %214, %216 : vector<2x2xf32>
    %218 = vector.extract_strided_slice %200 {offsets = [0, 0], sizes = [2, 2], strides = [1, 1]} : vector<2x6xf32> to vector<2x2xf32>
    %219 = arith.addf %217, %218 : vector<2x2xf32>
    %220 = vector.extract_strided_slice %162 {offsets = [0, 3], sizes = [2, 2], strides = [1, 1]} : vector<2x6xf32> to vector<2x2xf32>
    %221 = vector.extract_strided_slice %200 {offsets = [0, 3], sizes = [2, 2], strides = [1, 1]} : vector<2x6xf32> to vector<2x2xf32>
    %222 = arith.mulf %220, %221 : vector<2x2xf32>
    %223 = vector.extract_strided_slice %162 {offsets = [0, 2], sizes = [2, 1], strides = [1, 1]} : vector<2x6xf32> to vector<2x1xf32>
    %224 = vector.extract_strided_slice %162 {offsets = [0, 5], sizes = [2, 1], strides = [1, 1]} : vector<2x6xf32> to vector<2x1xf32>
    %225 = tpu.concatenate %219, %223, %222, %224 in 1 : vector<2x2xf32>, vector<2x1xf32>, vector<2x2xf32>, vector<2x1xf32> -> vector<2x6xf32>
    %c0_72 = arith.constant 0 : index
    %c0_73 = arith.constant 0 : index
    %226 = vector.load %arg21[%c0_72, %c0_73] : memref<2x6xf32, #tpu.memory_space<vmem>>, vector<2x6xf32>
    tpu.vector_store %arg21[%c0_72, %c0_73], %225 {strides = array<i32>} : memref<2x6xf32, #tpu.memory_space<vmem>>, vector<2x6xf32>,
    return
  }
}

</mosaic_0001>

<bundles_post_ra>
// kernel: ae_forward.5
= control target key start
LH: loop header
LB: loop body
LE: loop exit
PB: predicated region body
PF: predicated region fallthrough
CT: control target
= control target key end

     0   :  { %v355_v1 = vmov 0.0|0.0   ;;  %s356_s11 = smov 6   ;;  %vm357_vm0 = vmmov 0   ;;  %v358_v5 = vmov 0.0   ;;  %vm51_vm1 = vcmask 1045504   ;;  %s446_s1 = inlined_call_operand.vmem [shape: f32[4,16], index: 1, kind: input, shape index: {}]   ;;  %s447_s2 = inlined_call_operand.vmem [shape: f32[22,16], index: 2, kind: input, shape index: {}]   ;;  %s448_s0 = inlined_call_operand.vmem [shape: f32[4,6], index: 0, kind: input, shape index: {}]   ;;  %s449_s4 = inlined_call_operand.vmem [shape: f32[16,16], index: 4, kind: input, shape index: {}]   ;;  %s450_s3 = inlined_call_operand.vmem [shape: f32[1,16], index: 3, kind: input, shape index: {}]   ;;  %s451_s6 = inlined_call_operand.vmem [shape: f32[16,16], index: 6, kind: input, shape index: {}]   ;;  %s452_s5 = inlined_call_operand.vmem [shape: f32[1,16], index: 5, kind: input, shape index: {}]   ;;  %s453_s7 = inlined_call_operand.vmem [shape: f32[1,16], index: 7, kind: input, shape index: {}]   ;;  %s454_s8 = inlined_call_operand.vmem [shape: f32[2,16], index: 8, kind: output, shape index: {}]  }
   0x1   :  { %v30_v0 = vld [vmem:[%s446_s1] sm:$0xf]  ;;  %342 = vmatprep.subr.bf16.mxu0 %v355_v1  ;;  %v38_v3 = vld [vmem:[%s447_s2 + $0x8] sm:$0xff]  ;;  %345 = vmatprep.subr.bf16.mxu1 %v355_v1  ;;  %v39_v6 = vld [vmem:[%s447_s2 + $0x10] sm:$0x3f]  ;;  %vm35_vm2 = vcmask 48128  }
   0x2   :  { %v37_v2 = vld [vmem:[%s447_s2] sm:$0xff]  ;;  %32 = vrot.lane.b32.xlu0 %v30_v0, %s356_s11  ;;  %325 = vmatprep.mubr.msk.f32.mxu0 %vm357_vm0, %v358_v5  ;;  %vm47_vm3 = vcmask 179200   ;;  %v127_v11 = vld [vmem:[%s449_s4 + $0x8] sm:$0xff]  ;;  %vm135_vm4 = vcmask 130048   ;;  %vm296_vm5 = vcmask 123904  }
   0x3   :  { %v343_v4 = vpack.c.bf16 %v38_v3, %v37_v2  ;;  %332 = vmatprep.mubr.msk.f32.mxu1 %vm357_vm0, %v358_v5  ;;  %v29_v7 = vld [vmem:[%s448_s0] sm:$0xf]  ;;  %v211_v19 = vld [vmem:[%s451_s6 + $0x8] sm:$0xff] }
   0x4   :  { %v126_v10 = vld [vmem:[%s449_s4] sm:$0xff] }
   0x5   :  { %344 = vmatpush3.bf16.msra.mxu0 %v343_v4  ;;  %v346_v12 = vpack.c.bf16 %v127_v11, %v126_v10  ;;  %v302_v13 = vld [vmem:[%s450_s3] ss:$0 sm:$0xff] }
   0x6   :  { %323 = vmatprep.subr.mxu0 %v358_v5  ;;  %v210_v18 = vld [vmem:[%s451_s6] sm:$0xff] }
   0x7   :  { %347 = vmatpush3.bf16.msra.mxu1 %v346_v12  ;;  %v349_v20 = vpack.c.bf16 %v211_v19, %v210_v18  ;;  %v305_v21 = vld [vmem:[%s452_s5] ss:$0 sm:$0xff] }
   0x8   :  { %348 = vmatprep.subr.bf16.mxu1 %v355_v1  ;;  %v307_v26 = vld [vmem:[%s453_s7] ss:$0 sm:$0xff] }
   0x9   :  { %324 = vmatpush3.msk.msra.mxu0 %vm51_vm1, %v39_v6 }
  0x74   :  { %v33_v8 = vpop.permute.xlu0 %32 }
  0x75   :  { %v36_v9 = vsel %vm35_vm2, %v29_v7, %v33_v8 }
  0x76   :  { %326 = vmatmul.mubr.msk.f32.vlgmr.msra.gmra.mrb[0].mxu0 %vm47_vm3, %v36_v9 }
 0x149   :  { %v121_v14 = vpop.f32.mrb[0].mxu0 }
 0x14a   :  { %v122_v15 = vadd.f32 %v302_v13, %v121_v14  ;;  %v327_v16 = vpop.f32.mrb[1].mxu0 }
 0x14c   :  { %v125_v17 = vmax.f32 %v122_v15, 0.0 }
 0x14e   :  { %333 = vmatmul.mubr.msk.f32.vlgmr.msra.gmra.mrb[0].mxu1 %vm135_vm4, %v125_v17 }
 0x14f   :  { %339 = vmatprep.mubr.msk.f32.mxu1 %vm357_vm0, %v358_v5  ;;  %350 = vmatpush3.bf16.msra.mxu1 %v349_v20 }
 0x221   :  { %v205_v22 = vpop.f32.mrb[0].mxu1 }
 0x222   :  { %v206_v23 = vadd.f32 %v305_v21, %v205_v22  ;;  %v334_v24 = vpop.f32.mrb[1].mxu1 }
 0x224   :  { %v209_v25 = vmax.f32 %v206_v23, 0.0 }
 0x226   :  { %340 = vmatmul.mubr.msk.f32.vlgmr.msra.gmra.mrb[2].mxu1 %vm135_vm4, %v209_v25 }
 0x2f9   :  { %v288_v27 = vpop.f32.mrb[2].mxu1 }
 0x2fa   :  { %v289_v28 = vadd.f32 %v307_v26, %v288_v27  ;;  %v341_v29 = vpop.f32.mrb[3].mxu1 }
 0x2fc   :  { %v293_v30 = vrot.slane %v289_v28, 2 }
 0x2fe   :  { %v295_v31 = vadd.f32 %v293_v30, %v289_v28 }
 0x300   :  { %297 = vst.msk [vmem:[%s454_s8] sm:$0x3] %vm296_vm5, %v295_v31 }

// kernel: ae_forward.6
= control target key start
LH: loop header
LB: loop body
LE: loop exit
PB: predicated region body
PF: predicated region fallthrough
CT: control target
= control target key end

     0   :  { %v355_v1 = vmov 0.0|0.0   ;;  %s356_s11 = smov 6   ;;  %vm357_vm0 = vmmov 0   ;;  %v358_v5 = vmov 0.0   ;;  %vm51_vm1 = vcmask 1045504   ;;  %s446_s1 = inlined_call_operand.vmem [shape: f32[2,16], index: 1, kind: input, shape index: {}]   ;;  %s447_s2 = inlined_call_operand.vmem [shape: f32[22,16], index: 2, kind: input, shape index: {}]   ;;  %s448_s0 = inlined_call_operand.vmem [shape: f32[2,6], index: 0, kind: input, shape index: {}]   ;;  %s449_s4 = inlined_call_operand.vmem [shape: f32[16,16], index: 4, kind: input, shape index: {}]   ;;  %s450_s3 = inlined_call_operand.vmem [shape: f32[1,16], index: 3, kind: input, shape index: {}]   ;;  %s451_s6 = inlined_call_operand.vmem [shape: f32[16,16], index: 6, kind: input, shape index: {}]   ;;  %s452_s5 = inlined_call_operand.vmem [shape: f32[1,16], index: 5, kind: input, shape index: {}]   ;;  %s453_s7 = inlined_call_operand.vmem [shape: f32[1,16], index: 7, kind: input, shape index: {}]   ;;  %s454_s8 = inlined_call_operand.vmem [shape: f32[1,16], index: 8, kind: output, shape index: {}]  }
   0x1   :  { %v30_v0 = vld [vmem:[%s446_s1] sm:$0x3]  ;;  %342 = vmatprep.subr.bf16.mxu0 %v355_v1  ;;  %v38_v3 = vld [vmem:[%s447_s2 + $0x8] sm:$0xff]  ;;  %345 = vmatprep.subr.bf16.mxu1 %v355_v1  ;;  %v39_v6 = vld [vmem:[%s447_s2 + $0x10] sm:$0x3f]  ;;  %vm35_vm2 = vcmask 48128  }
   0x2   :  { %v37_v2 = vld [vmem:[%s447_s2] sm:$0xff]  ;;  %32 = vrot.lane.b32.xlu0 %v30_v0, %s356_s11  ;;  %325 = vmatprep.mubr.msk.f32.mxu0 %vm357_vm0, %v358_v5  ;;  %vm47_vm3 = vcmask 179200   ;;  %v127_v11 = vld [vmem:[%s449_s4 + $0x8] sm:$0xff]  ;;  %vm135_vm4 = vcmask 130048   ;;  %vm296_vm5 = vcmask 122880  }
   0x3   :  { %v343_v4 = vpack.c.bf16 %v38_v3, %v37_v2  ;;  %332 = vmatprep.mubr.msk.f32.mxu1 %vm357_vm0, %v358_v5  ;;  %v29_v7 = vld [vmem:[%s448_s0] sm:$0x3]  ;;  %v211_v19 = vld [vmem:[%s451_s6 + $0x8] sm:$0xff] }
   0x4   :  { %v126_v10 = vld [vmem:[%s449_s4] sm:$0xff] }
   0x5   :  { %344 = vmatpush3.bf16.msra.mxu0 %v343_v4  ;;  %v346_v12 = vpack.c.bf16 %v127_v11, %v126_v10  ;;  %v302_v13 = vld [vmem:[%s450_s3] ss:$0 sm:$0xff] }
   0x6   :  { %323 = vmatprep.subr.mxu0 %v358_v5  ;;  %v210_v18 = vld [vmem:[%s451_s6] sm:$0xff] }
   0x7   :  { %347 = vmatpush3.bf16.msra.mxu1 %v346_v12  ;;  %v349_v20 = vpack.c.bf16 %v211_v19, %v210_v18  ;;  %v305_v21 = vld [vmem:[%s452_s5] ss:$0 sm:$0xff] }
   0x8   :  { %348 = vmatprep.subr.bf16.mxu1 %v355_v1  ;;  %v307_v26 = vld [vmem:[%s453_s7] ss:$0 sm:$0xff] }
   0x9   :  { %324 = vmatpush3.msk.msra.mxu0 %vm51_vm1, %v39_v6 }
  0x74   :  { %v33_v8 = vpop.permute.xlu0 %32 }
  0x75   :  { %v36_v9 = vsel %vm35_vm2, %v29_v7, %v33_v8 }
  0x76   :  { %326 = vmatmul.mubr.msk.f32.vlgmr.msra.gmra.mrb[0].mxu0 %vm47_vm3, %v36_v9 }
 0x149   :  { %v121_v14 = vpop.f32.mrb[0].mxu0 }
 0x14a   :  { %v122_v15 = vadd.f32 %v302_v13, %v121_v14  ;;  %v327_v16 = vpop.f32.mrb[1].mxu0 }
 0x14c   :  { %v125_v17 = vmax.f32 %v122_v15, 0.0 }
 0x14e   :  { %333 = vmatmul.mubr.msk.f32.vlgmr.msra.gmra.mrb[0].mxu1 %vm135_vm4, %v125_v17 }
 0x14f   :  { %339 = vmatprep.mubr.msk.f32.mxu1 %vm357_vm0, %v358_v5  ;;  %350 = vmatpush3.bf16.msra.mxu1 %v349_v20 }
 0x221   :  { %v205_v22 = vpop.f32.mrb[0].mxu1 }
 0x222   :  { %v206_v23 = vadd.f32 %v305_v21, %v205_v22  ;;  %v334_v24 = vpop.f32.mrb[1].mxu1 }
 0x224   :  { %v209_v25 = vmax.f32 %v206_v23, 0.0 }
 0x226   :  { %340 = vmatmul.mubr.msk.f32.vlgmr.msra.gmra.mrb[2].mxu1 %vm135_vm4, %v209_v25 }
 0x2f9   :  { %v288_v27 = vpop.f32.mrb[2].mxu1 }
 0x2fa   :  { %v289_v28 = vadd.f32 %v307_v26, %v288_v27  ;;  %v341_v29 = vpop.f32.mrb[3].mxu1 }
 0x2fc   :  { %v293_v30 = vrot.slane %v289_v28, 1 }
 0x2fe   :  { %v295_v31 = vadd.f32 %v293_v30, %v289_v28 }
 0x300   :  { %297 = vst.msk [vmem:[%s454_s8] sm:$0x1] %vm296_vm5, %v295_v31 }

// kernel: ae_forward.9
= control target key start
LH: loop header
LB: loop body
LE: loop exit
PB: predicated region body
PF: predicated region fallthrough
CT: control target
= control target key end

     0   :  { %s114_s0 = inlined_call_operand.vmem [shape: f32[7,6], index: 0, kind: input, shape index: {}]   ;;  %s115_s1 = inlined_call_operand.vmem [shape: f32[7,6], index: 1, kind: input, shape index: {}]   ;;  %s116_s2 = inlined_call_operand.hbm [shape: f32[1], index: 2, kind: output, shape index: {}]  }
   0x1   :  { %v12_v0 = vld [vmem:[%s114_s0] sm:$0x7f] }
   0x2   :  { %v13_v1 = vld [vmem:[%s115_s1] sm:$0x7f] }
   0x3   :  { %v14_v2 = vsub.f32 %v13_v1, %v12_v0 }
   0x4   :  { %7 = vsyncpa [#allocation3], 0  ;;  %s79_s13 = smov 126   ;;  %vm16_vm0 = vcmask 14336   ;;  %vm32_vm1 = vcmask 30720   ;;  %s67_s19 = scalar_lea.hbm %s116_s2, 16 }
   0x5   :  { %v27_v3 = vand.u32 2147483647, %v14_v2  ;;  %v15_v4 = vmul.f32 %v14_v2, %v14_v2  ;;  %p68_p0 = scmp.ne.s32.totalorder %s116_s2, %s67_s19  ;;  %p71_p1 = scmp.lt.u32.totalorder %s67_s19, %s116_s2 }
   0x7   :  { %29 = vrot.lane.b32.xlu0 %v27_v3, %s79_s13  ;;  %v17_v5 = vsel %vm16_vm0, %v15_v4, 0.0  ;;  %p73_p2 = pnand %p71_p1, %p68_p0 }
  0x26   :  { %18 = vadd.xlane.f32.xlu0 %v17_v5 }
  0x79   :  { %v30_v6 = vpop.permute.xlu0 %29 }
  0x7a   :  { %v33_v7 = vsel %vm32_vm1, %v30_v6, 0.0 }
  0x7b   :  { %34 = vadd.xlane.f32.xlu1 %v33_v7 }
  0xb3   :  { %v19_v8 = vpop.xlane.xlu0 %18 }
  0xb4   :  { %v20_v9 = vrot.slane %v19_v8, 4 }
  0xb6   :  { %v21_v10 = vadd.f32 %v20_v9, %v19_v8 }
  0xb8   :  { %v22_v11 = vrot.slane %v21_v10, 2 }
  0xba   :  { %v23_v12 = vadd.f32 %v22_v11, %v21_v10 }
  0xbc   :  { %v24_v13 = vrot.slane %v23_v12, 1 }
  0xbe   :  { %v25_v14 = vadd.f32 %v24_v13, %v23_v12 }
  0xc0   :  { %61 = vpush %v25_v14 }
  0xf1   :  { %s62_s0 = spop %61 }
  0xf2   :  { %s43_s1 = smul.f32 0.071428575, %s62_s0 }
 0x108   :  { %v35_v15 = vpop.xlane.xlu1 %34 }
 0x109   :  { %v36_v16 = vrot.slane %v35_v15, 4 }
 0x10b   :  { %v37_v17 = vadd.f32 %v36_v16, %v35_v15 }
 0x10d   :  { %v38_v18 = vrot.slane %v37_v17, 2 }
 0x10f   :  { %v39_v19 = vadd.f32 %v38_v18, %v37_v17 }
 0x111   :  { %v40_v20 = vrot.slane %v39_v19, 1 }
 0x113   :  { %v41_v21 = vadd.f32 %v40_v20, %v39_v19 }
 0x115   :  { %63 = vpush %v41_v21 }
 0x146   :  { %s64_s14 = spop %63 }
 0x147   :  { %s44_s15 = smul.f32 0.035714287, %s64_s14 }
 0x149   :  { %s45_s16 = sadd.f32 %s44_s15, %s43_s1 }
 0x14b   :  { %47 = sst [smem:[#allocation2]] %s45_s16 }
 0x14c   :  { %76 = shalt.err (!%p73_p2)
}
 0x14d   :  { %s80_s24 = smov [#allocation2]  }
 0x14e   :  { %55 = dma.smem_to_hbm %s80_s24, 16, %s116_s2, [#allocation3]  }
 0x14f   :  { %77 = dma.done.wait [#allocation3], 16  }
 0x150   :  { %78 = vsyncadd [#allocation3], 4294967280 }
 0x151   :  { %59 = sfence }
 0x152   :  { %60 = vsyncpa [#allocation3], 1 }

// kernel: ae_forward.7
= control target key start
LH: loop header
LB: loop body
LE: loop exit
PB: predicated region body
PF: predicated region fallthrough
CT: control target
= control target key end

     0   :  { %s970_s0 = inlined_call_operand.vmem [shape: f32[1,16], index: 0, kind: input, shape index: {}]   ;;  %s971_s1 = inlined_call_operand.vmem [shape: f32[1,6], index: 1, kind: input, shape index: {}, may-alias: {1,8,9}]   ;;  %s972_s2 = inlined_call_operand.vmem [shape: f32[1,6], index: 2, kind: input, shape index: {}, may-alias: {2,6}]   ;;  %s973_s3 = inlined_call_operand.vmem [shape: f32[1,6], index: 3, kind: input, shape index: {}, may-alias: {3,7}]   ;;  %s974_s4 = inlined_call_operand.<no memory space> [shape: f32[1,1], index: 4, kind: input, shape index: {}]   ;;  %s975_s6 = inlined_call_operand.vmem [shape: f32[1,6], index: 6, kind: input, shape index: {}, may-alias: {2,6}]   ;;  %s976_s7 = inlined_call_operand.vmem [shape: f32[1,6], index: 7, kind: input, shape index: {}, may-alias: {3,7}]   ;;  %s977_s8 = inlined_call_operand.vmem [shape: f32[1,6], index: 8, kind: input, shape index: {}, may-alias: {1,8,9}]   ;;  %s978_s9 = inlined_call_operand.vmem [shape: f32[1,6], index: 9, kind: input, shape index: {}, may-alias: {1,8,9}]   ;;  %s979_s10 = inlined_call_operand.vmem [shape: f32[22,16], index: 10, kind: input, shape index: {}]   ;;  %s980_s11 = inlined_call_operand.vmem [shape: f32[1,16], index: 11, kind: input, shape index: {}]   ;;  %s981_s12 = inlined_call_operand.vmem [shape: f32[16,32], index: 12, kind: input, shape index: {}]   ;;  %s982_s13 = inlined_call_operand.vmem [shape: f32[1,32], index: 13, kind: input, shape index: {}]   ;;  %s983_s14 = inlined_call_operand.vmem [shape: f32[32,46], index: 14, kind: input, shape index: {}]   ;;  %s984_s15 = inlined_call_operand.vmem [shape: f32[1,46], index: 15, kind: input, shape index: {}]   ;;  %s985_s16 = inlined_call_operand.vmem [shape: f32[1,16], index: 16, kind: output, shape index: {0}]   ;;  %s986_s17 = inlined_call_operand.vmem [shape: f32[1,16], index: 17, kind: output, shape index: {1}]   ;;  %s987_s18 = inlined_call_operand.vmem [shape: f32[1,6], index: 18, kind: output, shape index: {2}]   ;;  %s988_s19 = inlined_call_operand.vmem [shape: f32[1,6], index: 19, kind: output, shape index: {3}]   ;;  %s989_s20 = inlined_call_operand.vmem [shape: f32[1,6], index: 20, kind: output, shape index: {4}]   ;;  %s990_s21 = inlined_call_operand.vmem [shape: f32[1,6], index: 21, kind: output, shape index: {5}]   ;;  %s991_s22 = inlined_call_operand.vmem [shape: f32[2], index: 22, kind: output, shape index: {6}]   ;;  %s992_s5 = inlined_call_operand.<no memory space> [shape: f32[1,1], index: 5, kind: input, shape index: {}]  }
   0x1   :  { %993 = sst [smem:[#allocation7_spill]] %s970_s0  ;;  %v30_v1 = vstv %s992_s5 }
   0x2   :  { %994 = sst [smem:[#allocation8_spill]] %s971_s1  ;;  %31 = vst [vmem:[#allocation3] sm:$0x1] %v30_v1 }
   0x3   :  { %995 = sst [smem:[#allocation9_spill]] %s972_s2 }
   0x4   :  { %996 = sst [smem:[#allocation10_spill]] %s973_s3 }
   0x5   :  { %997 = sst [smem:[#allocation11_spill]] %s974_s4 }
   0x6   :  { %998 = sst [smem:[#allocation12_spill]] %s975_s6  ;;  %s1000_s29 = sld [smem:[#allocation11_spill]] }
   0x7   :  { %999 = sst [smem:[#allocation13_spill]] %s976_s7 }
   0xc   :  { %v28_v0 = vstv %s1000_s29 }
   0xd   :  { %29 = vst [vmem:[#allocation2] sm:$0x1] %v28_v0 }
   0xe   :  { %s1001_s1 = sld [smem:[#allocation8_spill]]  ;;  %v77_v3 = vld [vmem:[%s979_s10] sm:$0xff]  ;;  %v78_v4 = vld [vmem:[%s979_s10 + $0x8] sm:$0xff]  ;;  %s687_s26 = smov 16   ;;  %v688_v5 = vmov 0.0|0.0   ;;  %vm689_vm0 = vmmov 0  }
   0xf   :  { %631 = vmatprep.subr.bf16.mxu0 %v688_v5  ;;  %v632_v6 = vpack.c.bf16 %v78_v4, %v77_v3  ;;  %637 = vmatprep.subr.bf16.mxu1 %v688_v5  ;;  %v690_v7 = vmov 0.0  }
  0x10   :  { %610 = vmatprep.mubr.msk.f32.mxu0 %vm689_vm0, %v690_v7 }
  0x11   :  { %633 = vmatpush3.bf16.msra.mxu0 %v632_v6 }
  0x14   :  { %v586_v2 = vld [vmem:[%s1001_s1] ss:$0 sm:$0xff] }
  0x15   :  { %72 = vrot.lane.b32.xlu0 %v586_v2, %s687_s26 }
  0x16   :  { %32 = vsyncpa [#allocation5], 0  ;;  %608 = vmatprep.subr.mxu0 %v690_v7  ;;  %v79_v8 = vld [vmem:[%s979_s10 + $0x10] sm:$0x3f]  ;;  %vm85_vm1 = vcmask 1045504   ;;  %628 = vmatprep.mubr.msk.f32.mxu1 %vm689_vm0, %v690_v7  ;;  %vm75_vm2 = vcmask 130048   ;;  %v412_v44 = vlaneseq }
  0x17   :  { %609 = vmatpush3.msk.msra.mxu0 %vm85_vm1, %v79_v8  ;;  %s1002_s28 = sld [smem:[#allocation7_spill]]  ;;  %vm81_vm3 = vcmask 179200   ;;  %v160_v12 = vld [vmem:[%s981_s12] sm:$0xff]  ;;  %v161_v13 = vld [vmem:[%s981_s12 + $0x8] sm:$0xff]  ;;  %v239_v23 = vld [vmem:[%s983_s14 + $0x10] sm:$0xff]  ;;  %vm242_vm4 = vcmask 261120  }
  0x18   :  { %634 = vmatprep.subr.bf16.mxu0 %v688_v5  ;;  %v635_v14 = vpack.c.bf16 %v161_v13, %v160_v12  ;;  %v237_v15 = vld [vmem:[%s983_s14] sm:$0xff]  ;;  %v238_v16 = vld [vmem:[%s983_s14 + $0x8] sm:$0xff]  ;;  %v240_v24 = vld [vmem:[%s983_s14 + $0x18] sm:$0xff]  ;;  %s692_s14 = smov 89   ;;  %vm331_vm5 = vcmask 15360   ;;  %s1003_s29 = sld [smem:[#allocation9_spill]] }
  0x19   :  { %v638_v17 = vpack.c.bf16 %v238_v16, %v237_v15  ;;  %v80_v18 = vld [vmem:[%s980_s11] sm:$0x1]  ;;  %v641_v25 = vpack.c.bf16 %v240_v24, %v239_v23  ;;  %v693_v42 = vmov 1966171168   ;;  %v880_v53 = vshrl.u32 %v412_v44, 7  ;;  %s1004_s4 = sld [smem:[#allocation10_spill]] }
  0x1a   :  { %v162_v26 = vld [vmem:[%s982_s13] sm:$0x1]  ;;  %s691_s13 = smov 112   ;;  %v410_v43 = vunpack.c.l.s4 %v693_v42  ;;  %s694_s0 = smov 126   ;;  %vm344_vm6 = vcmask 8192   ;;  %vm353_vm7 = vcmask 24576  }
  0x1b   :  { %639 = vmatpush3.bf16.msra.mxu1 %v638_v17  ;;  %v241_v31 = vld [vmem:[%s984_s15] sm:$0x1]  ;;  %s695_s23 = smov 106   ;;  %s696_s1 = smov 83   ;;  %vm487_vm9 = vcmask 122880   ;;  %vm509_vm10 = vcmask 23552  }
  0x1c   :  { %640 = vmatprep.subr.bf16.mxu1 %v688_v5  ;;  %v411_v52 = vunpack.c.0.s8 %v410_v43  ;;  %s698_s6 = smov 23   ;;  %s699_s24 = smov 105   ;;  %vm511_vm11 = vcmask 39936   ;;  %vm513_vm12 = vcmask 40960  }
  0x1d   :  { %v65_v9 = vld [vmem:[%s1002_s28] sm:$0x1] }
  0x1e   :  { %v340_v45 = vld [vmem:[%s1003_s29] sm:$0x1]  ;;  %v414_v63 = vsub.s32 %v411_v52, %v880_v53 }
  0x1f   :  { %642 = vmatpush3.bf16.msra.mxu1 %v641_v25  ;;  %v341_v59 = vld [vmem:[%s1004_s4] sm:$0x1] }
  0x87   :  { %v73_v10 = vpop.permute.xlu0 %72 }
  0x88   :  { %v76_v11 = vsel %vm75_vm2, %v65_v9, %v73_v10  ;;  %v697_v9 = vmov 2  }
  0x89   :  { %611 = vmatmul.mubr.msk.f32.vlgmr.msra.gmra.mrb[0].mxu0 %vm81_vm3, %v76_v11  ;;  %662 = vset.pattern.permute.xlu1 %v697_v9 }
  0x8a   :  { %617 = vmatprep.mubr.msk.f32.mxu0 %vm689_vm0, %v690_v7  ;;  %636 = vmatpush3.bf16.msra.mxu0 %v635_v14 }
  0x8b   :  { %661 = vset.pattern.permute.xlu0 %v697_v9 }
 0x15c   :  { %v155_v19 = vpop.f32.mrb[0].mxu0 }
 0x15d   :  { %v156_v20 = vadd.f32 %v155_v19, %v80_v18  ;;  %v612_v21 = vpop.f32.mrb[1].mxu0 }
 0x15f   :  { %v159_v22 = vmax.f32 %v156_v20, 0.0 }
 0x161   :  { %618 = vmatmul.mubr.msk.f32.vlgmr.msra.gmra.mrb[2].mxu0 %vm75_vm2, %v159_v22 }
 0x234   :  { %v232_v27 = vpop.f32.mrb[2].mxu0 }
 0x235   :  { %v233_v28 = vadd.f32 %v232_v27, %v162_v26  ;;  %v619_v29 = vpop.f32.mrb[3].mxu0  ;;  %v523_v26 = vld [vmem:[%s978_s9] sm:$0x1] }
 0x237   :  { %v236_v30 = vmax.f32 %v233_v28, 0.0 }
 0x239   :  { %629 = vmatmul.mubr.msk.f32.vlgmr.msra.gmra.mrb[0].mxu1 %vm242_vm4, %v236_v30 }
 0x30c   :  { %v312_v32 = vpop.f32.mrb[0].mxu1 }
 0x30d   :  { %v869_v33 = vadd.f32 %v312_v32, %v241_v31  ;;  %v630_v34 = vpop.f32.mrb[1].mxu1 }
 0x30f   :  { %663 = vtanh.f32 %v869_v33  ;;  %v591_v35 = vmul.f32 -1.442695, %v869_v33 }
 0x311   :  { %665 = vpow2.f32 %v591_v35 }
 0x319   :  { %v664_v36 = vpop.eup %663 }
 0x31a   :  { %324 = vrot.lane.b32.xlu0 %v664_v36, %s691_s13 }
 0x31b   :  { %v666_v37 = vpop.eup %665 }
 0x31c   :  { %v320_v38 = vadd.f32 1.0, %v666_v37 }
 0x31e   :  { %667 = vrcp.f32 %v320_v38  ;;  %v404_v38 = vld [vmem:[#allocation2] sm:$0x1] }
 0x328   :  { %v668_v39 = vpop.eup %667 }
 0x329   :  { %328 = vrot.lane.b32.xlu1 %v668_v39, %s691_s13  ;;  %336 = vrot.lane.b32.xlu0 %v668_v39, %s692_s14  ;;  %v428_v40 = vsub.f32 1.0, %v668_v39  ;;  %s565_s13 = sshll.u32 %s991_s22, 4  ;;  %s566_s13 = int_to_ptr.vmem [resolvable:$true] %s565_s13 }
 0x32a   :  { %s673_s28 = scalar_lea.vmem %s566_s13, 16  ;;  %p678_p1 = scmp.lt.s32.totalorder %s566_s13, %s566_s13 }
 0x32b   :  { %669 = vlog2.f32 %v428_v40  ;;  %p674_p0 = scmp.ne.s32.totalorder %s566_s13, %s673_s28  ;;  %p679_p2 = scmp.lt.s32.totalorder %s673_s28, %s673_s28 }
 0x32c   :  { %671 = vlog2.f32 %v668_v39 }
 0x32d   :  { %333 = vrot.lane.b32.xlu1 %v664_v36, %s692_s14  ;;  %v453_v36 = vld [vmem:[#allocation3] sm:$0x1]  ;;  %p680_p3 = por %p679_p2, %p678_p1 }
 0x32e   :  { %v458_v37 = vsub.f32 1.0, %v453_v36 }
 0x32f   :  { %p681_p4 = pnand %p680_p3, %p674_p0 }
 0x335   :  { %v670_v41 = vpop.eup %669 }
 0x336   :  { %v672_v46 = vpop.eup %671  ;;  %v430_v49 = vmul.f32 0.6931472, %v670_v41  ;;  %v427_v41 = vsub.f32 1.0, %v404_v38 }
 0x337   :  { %v406_v54 = vmul.f32 0.6931472, %v672_v46 }
 0x338   :  { %v431_v58 = vmax.f32 %v430_v49, -100.0 }
 0x339   :  { %v407_v0 = vmax.f32 %v406_v54, -100.0 }
 0x33a   :  { %v439_v4 = vrot.slane %v431_v58, %v414_v63 }
 0x33b   :  { %v415_v7 = vrot.slane %v407_v0, %v414_v63 }
 0x33c   :  { %v446_v5 = vrot.slane %v439_v4, %v414_v63 }
 0x33d   :  { %v422_v8 = vrot.slane %v415_v7, %v414_v63 }
 0x38c   :  { %v325_v47 = vpop.permute.xlu0 %324 }
 0x39b   :  { %v329_v48 = vpop.permute.xlu1 %328  ;;  %v337_v55 = vpop.permute.xlu0 %336 }
 0x39c   :  { %v877_v50 = vsel %vm331_vm5, %v325_v47, %v329_v48 }
 0x39d   :  { %v342_v51 = vsub.f32 %v877_v50, %v340_v45  ;;  %v387_v1 = vsub.f32 %v877_v50, %v341_v59 }
 0x39f   :  { %v334_v56 = vpop.permute.xlu1 %333  ;;  %v348_v57 = vand.u32 2147483647, %v342_v51  ;;  %v392_v6 = vand.u32 2147483647, %v387_v1  ;;  %v343_v13 = vmul.f32 %v342_v51, %v342_v51  ;;  %v388_v15 = vmul.f32 %v387_v1, %v387_v1 }
 0x3a0   :  { %v886_v60 = vsel %vm331_vm5, %v334_v56, %v337_v55 }
 0x3a1   :  { %v358_v61 = vsub.f32 %v886_v60, %v341_v59  ;;  %v373_v62 = vsub.f32 %v886_v60, %v340_v45  ;;  %350 = vrot.lane.b32.xlu1 %v348_v57, %s694_s0  ;;  %v345_v16 = vsel %vm344_vm6, %v343_v13, 0.0  ;;  %v389_v17 = vsel %vm344_vm6, %v388_v15, 0.0 }
 0x3a3   :  { %v378_v2 = vand.u32 2147483647, %v373_v62  ;;  %v363_v3 = vand.u32 2147483647, %v358_v61  ;;  %v359_v10 = vmul.f32 %v358_v61, %v358_v61  ;;  %v374_v12 = vmul.f32 %v373_v62, %v373_v62 }
 0x3a5   :  { %380 = vrot.lane.b32.xlu1 %v378_v2, %s694_s0  ;;  %365 = vrot.lane.b32.xlu0 %v363_v3, %s694_s0  ;;  %v360_v11 = vsel %vm344_vm6, %v359_v10, 0.0  ;;  %v375_v14 = vsel %vm344_vm6, %v374_v12, 0.0  ;;  %v494_v3 = vld [vmem:[%s977_s8] sm:$0x1] }
 0x3a9   :  { %447 = vrot.lane.b32.xlu1 %v446_v5, %s695_s23  ;;  %394 = vrot.lane.b32.xlu0 %v392_v6, %s694_s0 }
 0x3ad   :  { %454 = vrot.lane.b32.xlu1 %v422_v8, %s696_s1  ;;  %423 = vrot.lane.b32.xlu0 %v422_v8, %s695_s23 }
 0x3cc   :  { %361 = vadd.xlane.f32.xlu0 %v360_v11 }
 0x3d0   :  { %376 = vadd.xlane.f32.xlu0 %v375_v14 }
 0x3d1   :  { %346 = vadd.xlane.f32.xlu1 %v345_v16 }
 0x3d4   :  { %390 = vadd.xlane.f32.xlu0 %v389_v17 }
 0x413   :  { %v351_v18 = vpop.permute.xlu1 %350 }
 0x414   :  { %v354_v19 = vsel %vm353_vm7, %v351_v18, 0.0 }
 0x415   :  { %355 = vadd.xlane.f32.xlu0 %v354_v19 }
 0x417   :  { %v366_v20 = vpop.permute.xlu0 %365  ;;  %v381_v22 = vpop.permute.xlu1 %380 }
 0x418   :  { %v368_v21 = vsel %vm353_vm7, %v366_v20, 0.0  ;;  %v383_v23 = vsel %vm353_vm7, %v381_v22, 0.0 }
 0x419   :  { %369 = vadd.xlane.f32.xlu1 %v368_v21 }
 0x41b   :  { %v395_v24 = vpop.permute.xlu0 %394  ;;  %v448_v29 = vpop.permute.xlu1 %447 }
 0x41c   :  { %v397_v25 = vsel %vm353_vm7, %v395_v24, 0.0  ;;  %v450_v46 = vmul.f32 %v448_v29, %v427_v41 }
 0x41d   :  { %384 = vadd.xlane.f32.xlu1 %v383_v23 }
 0x41f   :  { %v424_v27 = vpop.permute.xlu0 %423  ;;  %v455_v31 = vpop.permute.xlu1 %454 }
 0x420   :  { %v457_v43 = vmul.f32 %v455_v31, %v453_v36  ;;  %v426_v44 = vmul.f32 %v424_v27, %v404_v38 }
 0x421   :  { %398 = vadd.xlane.f32.xlu1 %v397_v25 }
 0x422   :  { %v451_v49 = vadd.f32 %v450_v46, %v426_v44 }
 0x424   :  { %v452_v59 = vsub.f32 0.0, %v451_v49 }
 0x42b   :  { %459 = vrot.lane.b32.xlu0 %v446_v5, %s696_s1  ;;  %v503_v5 = vsub.s32 0, %v880_v53 }
 0x432   :  { %479 = vrot.lane.b32.xlu1 %v869_v33, %s698_s6 }
 0x436   :  { %489 = vrot.lane.b32.xlu1 %v869_v33, %s699_s24 }
 0x43a   :  { %526 = vperm.xlu1 %662, %v523_v26  }
 0x459   :  { %v362_v28 = vpop.xlane.xlu0 %361 }
 0x45d   :  { %v377_v30 = vpop.xlane.xlu0 %376 }
 0x45e   :  { %v347_v34 = vpop.xlane.xlu1 %346 }
 0x461   :  { %v391_v32 = vpop.xlane.xlu0 %390 }
 0x4a2   :  { %v356_v35 = vpop.xlane.xlu0 %355 }
 0x4a3   :  { %v357_v52 = vadd.f32 %v356_v35, %v347_v34 }
 0x4a6   :  { %v370_v39 = vpop.xlane.xlu1 %369  ;;  %v460_v40 = vpop.permute.xlu0 %459 }
 0x4a7   :  { %v462_v42 = vmul.f32 %v460_v40, %v458_v37  ;;  %v371_v48 = vadd.f32 %v370_v39, %v362_v28 }
 0x4a9   :  { %v463_v47 = vadd.f32 %v462_v42, %v457_v43  ;;  %v372_v57 = vadd.f32 %v371_v48, %v357_v52 }
 0x4aa   :  { %v385_v45 = vpop.xlane.xlu1 %384 }
 0x4ab   :  { %v386_v54 = vadd.f32 %v385_v45, %v377_v30  ;;  %v464_v56 = vsub.f32 0.0, %v463_v47 }
 0x4ad   :  { %v465_v1 = vadd.f32 %v464_v56, %v452_v59 }
 0x4ae   :  { %v399_v51 = vpop.xlane.xlu1 %398 }
 0x4af   :  { %v400_v55 = vadd.f32 %v399_v51, %v391_v32 }
 0x4b1   :  { %v401_v58 = vadd.f32 %v400_v55, %v386_v54 }
 0x4b2   :  { %v480_v61 = vpop.permute.xlu1 %479 }
 0x4b3   :  { %vm900_vm8 = vcmp.lt.f32.partialorder %v401_v58, %v372_v57 }
 0x4b4   :  { %v482_v63 = vsel %vm900_vm8, %v869_v33, %v480_v61  ;;  %v403_v0 = vsel %vm900_vm8, %v401_v58, %v372_v57  ;;  %v476_v8 = vsel %vm900_vm8, %v886_v60, %v877_v50 }
 0x4b5   :  { %484 = vrot.lane.b32.xlu0 %v482_v63, %s699_s24  ;;  %643 = vpush %v403_v0  ;;  %v535_v12 = vmul.f32 %v523_v26, %v476_v8 }
 0x4b6   :  { %645 = vpush %v465_v1  ;;  %v490_v2 = vpop.permute.xlu1 %489 }
 0x4b7   :  { %v492_v4 = vsel %vm900_vm8, %v869_v33, %v490_v2  ;;  %v477_v33 = vsel %vm900_vm8, %v877_v50, %v886_v60 }
 0x4b8   :  { %493 = vst.msk [vmem:[%s986_s17] sm:$0x1] %vm487_vm9, %v492_v4  ;;  %v542_v13 = vmul.f32 %v523_v26, %v477_v33 }
 0x4b9   :  { %498 = vperm.xlu0 %661, %v494_v3  }
 0x4ba   :  { %v527_v6 = vpop.permute.xlu1 %526 }
 0x4bb   :  { %v532_v7 = vrot.slane %v527_v6, %v503_v5 }
 0x4bd   :  { %v533_v9 = vmul.f32 %v532_v7, %v476_v8  ;;  %v540_v53 = vmul.f32 %v532_v7, %v477_v33 }
 0x4bf   :  { %v534_v10 = vadd.f32 %v533_v9, %v523_v26  ;;  %v541_v11 = vadd.f32 %v540_v53, %v523_v26 }
 0x4c1   :  { %v536_v14 = vsel %vm331_vm5, %v534_v10, %v476_v8  ;;  %v543_v15 = vsel %vm331_vm5, %v541_v11, %v477_v33 }
 0x4c2   :  { %v537_v16 = vsel %vm509_vm10, %v536_v14, %v535_v12  ;;  %v544_v17 = vsel %vm509_vm10, %v543_v15, %v542_v13 }
 0x4c3   :  { %v538_v18 = vsel %vm511_vm11, %v537_v16, %v476_v8  ;;  %v545_v50 = vsel %vm511_vm11, %v544_v17, %v477_v33 }
 0x4c4   :  { %539 = vst.msk [vmem:[%s989_s20] sm:$0x1] %vm513_vm12, %v538_v18  ;;  %546 = vst.msk [vmem:[%s990_s21] sm:$0x1] %vm513_vm12, %v545_v50 }
 0x4e6   :  { %s644_s14 = spop %643 }
 0x4e7   :  { %469 = sst [smem:[#allocation4]] %s644_s14  ;;  %s646_s15 = spop %645 }
 0x4e8   :  { %473 = sst [smem:[#allocation4 + $0x1]] %s646_s15 }
 0x4e9   :  { %684 = shalt.err (!%p681_p4)
}
 0x4ea   :  { %s700_s20 = smov [#allocation4]   ;;  %s1007_s10 = sld [smem:[#allocation12_spill]] }
 0x4eb   :  { %568 = dma.smem_to_vmem %s700_s20, 16, %s566_s13, [#allocation5]  }
 0x4ec   :  { %s1008_s23 = sld [smem:[#allocation13_spill]] }
 0x4f0   :  { %v495_v19 = vld [vmem:[%s1007_s10] sm:$0x1] }
 0x4f1   :  { %v507_v25 = vmul.f32 %v495_v19, %v494_v3 }
 0x4f2   :  { %v515_v20 = vld [vmem:[%s1008_s23] sm:$0x1] }
 0x4f3   :  { %v518_v26 = vmul.f32 %v515_v20, %v494_v3 }
 0x527   :  { %v485_v60 = vpop.permute.xlu0 %484 }
 0x528   :  { %488 = vst.msk [vmem:[%s985_s16] sm:$0x1] %vm487_vm9, %v485_v60 }
 0x538   :  { %v499_v21 = vpop.permute.xlu0 %498 }
 0x539   :  { %v504_v22 = vrot.slane %v499_v21, %v503_v5 }
 0x53b   :  { %v505_v23 = vmul.f32 %v504_v22, %v495_v19  ;;  %v516_v24 = vmul.f32 %v515_v20, %v504_v22 }
 0x53d   :  { %v506_v27 = vadd.f32 %v505_v23, %v494_v3  ;;  %v517_v28 = vadd.f32 %v516_v24, %v494_v3 }
 0x53f   :  { %v508_v29 = vsel %vm331_vm5, %v506_v27, %v495_v19  ;;  %v519_v30 = vsel %vm331_vm5, %v517_v28, %v515_v20 }
 0x540   :  { %v510_v31 = vsel %vm509_vm10, %v508_v29, %v507_v25  ;;  %v520_v32 = vsel %vm509_vm10, %v519_v30, %v518_v26 }
 0x541   :  { %v512_v34 = vsel %vm511_vm11, %v510_v31, %v495_v19  ;;  %v521_v35 = vsel %vm511_vm11, %v520_v32, %v515_v20 }
 0x542   :  { %514 = vst.msk [vmem:[%s987_s18] sm:$0x1] %vm513_vm12, %v512_v34  ;;  %522 = vst.msk [vmem:[%s988_s19] sm:$0x1] %vm513_vm12, %v521_v35 }
 0x543   :  { %685 = dma.done.wait [#allocation5], 16  }
 0x544   :  { %686 = vsyncadd [#allocation5], 4294967280 }
 0x545   :  { %584 = sfence }
 0x546   :  { %585 = vsyncpa [#allocation5], 1 }

// kernel: ae_forward.8
= control target key start
LH: loop header
LB: loop body
LE: loop exit
PB: predicated region body
PF: predicated region fallthrough
CT: control target
= control target key end

     0   :  { %s1054_s0 = inlined_call_operand.vmem [shape: f32[2,16], index: 0, kind: input, shape index: {}]   ;;  %s1055_s1 = inlined_call_operand.vmem [shape: f32[2,6], index: 1, kind: input, shape index: {}]   ;;  %s1056_s2 = inlined_call_operand.vmem [shape: f32[2,6], index: 2, kind: input, shape index: {}]   ;;  %s1057_s3 = inlined_call_operand.vmem [shape: f32[2,6], index: 3, kind: input, shape index: {}]   ;;  %s1058_s4 = inlined_call_operand.vmem [shape: f32[2,1], index: 4, kind: input, shape index: {}]   ;;  %s1059_s5 = inlined_call_operand.vmem [shape: f32[2,1], index: 5, kind: input, shape index: {}]   ;;  %s1060_s6 = inlined_call_operand.vmem [shape: f32[2,6], index: 6, kind: input, shape index: {}]   ;;  %s1061_s7 = inlined_call_operand.vmem [shape: f32[2,6], index: 7, kind: input, shape index: {}]   ;;  %s1062_s8 = inlined_call_operand.vmem [shape: f32[2,6], index: 8, kind: input, shape index: {}]   ;;  %s1063_s9 = inlined_call_operand.vmem [shape: f32[2,6], index: 9, kind: input, shape index: {}]   ;;  %s1064_s10 = inlined_call_operand.vmem [shape: f32[22,16], index: 10, kind: input, shape index: {}]   ;;  %s1065_s11 = inlined_call_operand.vmem [shape: f32[1,16], index: 11, kind: input, shape index: {}]   ;;  %s1066_s12 = inlined_call_operand.vmem [shape: f32[16,32], index: 12, kind: input, shape index: {}]   ;;  %s1067_s13 = inlined_call_operand.vmem [shape: f32[1,32], index: 13, kind: input, shape index: {}]   ;;  %s1068_s14 = inlined_call_operand.vmem [shape: f32[32,46], index: 14, kind: input, shape index: {}]   ;;  %s1069_s15 = inlined_call_operand.vmem [shape: f32[1,46], index: 15, kind: input, shape index: {}]   ;;  %s1070_s16 = inlined_call_operand.hbm [shape: f32[2,16], index: 16, kind: output, shape index: {0}]   ;;  %s1071_s17 = inlined_call_operand.hbm [shape: f32[2,16], index: 17, kind: output, shape index: {1}]   ;;  %s1072_s18 = inlined_call_operand.vmem [shape: f32[2,6], index: 18, kind: output, shape index: {2}]   ;;  %s1073_s19 = inlined_call_operand.vmem [shape: f32[2,6], index: 19, kind: output, shape index: {3}]   ;;  %s1074_s20 = inlined_call_operand.vmem [shape: f32[2,6], index: 20, kind: output, shape index: {4}]   ;;  %s1075_s21 = inlined_call_operand.vmem [shape: f32[2,6], index: 21, kind: output, shape index: {5}]   ;;  %s1076_s22 = inlined_call_operand.vmem [shape: f32[2], index: 22, kind: output, shape index: {6}]  }
   0x1   :  { %1077 = sst [smem:[#allocation11_spill]] %s1054_s0 }
   0x2   :  { %1078 = sst [smem:[#allocation12_spill]] %s1055_s1 }
   0x3   :  { %1079 = sst [smem:[#allocation13_spill]] %s1056_s2 }
   0x4   :  { %1080 = sst [smem:[#allocation14_spill]] %s1057_s3 }
   0x5   :  { %1081 = sst [smem:[#allocation15_spill]] %s1058_s4 }
   0x6   :  { %1082 = sst [smem:[#allocation16_spill]] %s1059_s5 }
   0x7   :  { %1083 = sst [smem:[#allocation17_spill]] %s1060_s6 }
   0x8   :  { %28 = vsyncpa [#allocation3], 0 }
   0x9   :  { %29 = vsyncpa [#allocation6], 0  ;;  %s1084_s29 = sld [smem:[#allocation12_spill]]  ;;  %v71_v1 = vld [vmem:[%s1064_s10] sm:$0xff]  ;;  %v72_v2 = vld [vmem:[%s1064_s10 + $0x8] sm:$0xff]  ;;  %s753_s1 = smov 16  }
   0xa   :  { %v754_v3 = vmov 0.0|0.0   ;;  %v649_v4 = vpack.c.bf16 %v72_v2, %v71_v1  ;;  %vm755_vm0 = vmmov 0   ;;  %v756_v5 = vmov 0.0  }
   0xb   :  { %648 = vmatprep.subr.bf16.mxu0 %v754_v3  ;;  %654 = vmatprep.subr.bf16.mxu1 %v754_v3 }
   0xc   :  { %650 = vmatpush3.bf16.msra.mxu0 %v649_v4  ;;  %627 = vmatprep.mubr.msk.f32.mxu0 %vm755_vm0, %v756_v5 }
   0xf   :  { %v64_v0 = vld [vmem:[%s1084_s29] sm:$0x3] }
  0x10   :  { %66 = vrot.lane.b32.xlu0 %v64_v0, %s753_s1 }
  0x11   :  { %30 = vsyncpa [#allocation4], 0  ;;  %625 = vmatprep.subr.mxu0 %v756_v5  ;;  %v73_v6 = vld [vmem:[%s1064_s10 + $0x10] sm:$0x3f]  ;;  %vm85_vm1 = vcmask 1045504   ;;  %645 = vmatprep.mubr.msk.f32.mxu1 %vm755_vm0, %v756_v5  ;;  %vm69_vm2 = vcmask 130048  }
  0x12   :  { %626 = vmatpush3.msk.msra.mxu0 %vm85_vm1, %v73_v6  ;;  %s1085_s26 = sld [smem:[#allocation11_spill]]  ;;  %vm81_vm3 = vcmask 179200   ;;  %v160_v10 = vld [vmem:[%s1066_s12] sm:$0xff]  ;;  %v161_v11 = vld [vmem:[%s1066_s12 + $0x8] sm:$0xff]  ;;  %v245_v21 = vld [vmem:[%s1068_s14 + $0x10] sm:$0xff]  ;;  %vm254_vm4 = vcmask 261120  }
  0x13   :  { %651 = vmatprep.subr.bf16.mxu0 %v754_v3  ;;  %v652_v12 = vpack.c.bf16 %v161_v11, %v160_v10  ;;  %v243_v13 = vld [vmem:[%s1068_s14] sm:$0xff]  ;;  %v244_v14 = vld [vmem:[%s1068_s14 + $0x8] sm:$0xff]  ;;  %v246_v22 = vld [vmem:[%s1068_s14 + $0x18] sm:$0xff]  ;;  %s758_s14 = smov 89   ;;  %vm343_vm5 = vcmask 15360   ;;  %s1086_s27 = sld [smem:[#allocation13_spill]] }
  0x14   :  { %v655_v15 = vpack.c.bf16 %v244_v14, %v243_v13  ;;  %v601_v16 = vld [vmem:[%s1065_s11] ss:$0 sm:$0xff]  ;;  %v658_v23 = vpack.c.bf16 %v246_v22, %v245_v21  ;;  %s1087_s28 = sld [smem:[#allocation14_spill]]  ;;  %s759_s29 = smov 126   ;;  %vm356_vm6 = vcmask 9216   ;;  %vm365_vm7 = vcmask 25600  }
  0x15   :  { %v604_v24 = vld [vmem:[%s1067_s13] ss:$0 sm:$0xff]  ;;  %s757_s13 = smov 112   ;;  %s760_s30 = smov 106   ;;  %vm450_vm8 = vcmask 1024   ;;  %vm508_vm10 = vcmask 23552  }
  0x16   :  { %656 = vmatpush3.bf16.msra.mxu1 %v655_v15  ;;  %v606_v29 = vld [vmem:[%s1069_s15] ss:$0 sm:$0xff]  ;;  %s761_s4 = smov 83   ;;  %s1088_s12 = sld [smem:[#allocation15_spill]]  ;;  %vm510_vm11 = vcmask 39936   ;;  %vm512_vm12 = vcmask 41984  }
  0x17   :  { %657 = vmatprep.subr.bf16.mxu1 %v754_v3  ;;  %s1089_s24 = sld [smem:[#allocation16_spill]]  ;;  %s762_s6 = smov 23  }
  0x18   :  { %v63_v7 = vld [vmem:[%s1085_s26] sm:$0x3]  ;;  %s764_s26 = smov 105   ;;  %s1092_s2 = sld [smem:[#allocation17_spill]] }
  0x19   :  { %v352_v39 = vld [vmem:[%s1086_s27] sm:$0x3]  ;;  %s576_s23 = sshll.u32 %s1076_s22, 4  ;;  %s577_s23 = int_to_ptr.vmem [resolvable:$true] %s576_s23 }
  0x1a   :  { %659 = vmatpush3.bf16.msra.mxu1 %v658_v23  ;;  %v353_v48 = vld [vmem:[%s1087_s28] sm:$0x3]  ;;  %s691_s5 = scalar_lea.vmem %s577_s23, 16  ;;  %p696_p1 = scmp.lt.s32.totalorder %s577_s23, %s577_s23 }
  0x1b   :  { %p692_p0 = scmp.ne.s32.totalorder %s577_s23, %s691_s5  ;;  %p697_p2 = scmp.lt.s32.totalorder %s691_s5, %s691_s5 }
  0x1d   :  { %v437_v23 = vld [vmem:[%s1089_s24] sm:$0x3]  ;;  %p698_p3 = por %p697_p2, %p696_p1 }
  0x1f   :  { %p699_p4 = pnand %p698_p3, %p692_p0 }
  0x82   :  { %v67_v8 = vpop.permute.xlu0 %66 }
  0x83   :  { %v70_v9 = vsel %vm69_vm2, %v63_v7, %v67_v8 }
  0x84   :  { %628 = vmatmul.mubr.msk.f32.vlgmr.msra.gmra.mrb[0].mxu0 %vm81_vm3, %v70_v9 }
  0x85   :  { %634 = vmatprep.mubr.msk.f32.mxu0 %vm755_vm0, %v756_v5  ;;  %653 = vmatpush3.bf16.msra.mxu0 %v652_v12 }
 0x157   :  { %v155_v17 = vpop.f32.mrb[0].mxu0 }
 0x158   :  { %v156_v18 = vadd.f32 %v601_v16, %v155_v17  ;;  %v629_v19 = vpop.f32.mrb[1].mxu0 }
 0x15a   :  { %v159_v20 = vmax.f32 %v156_v18, 0.0 }
 0x15c   :  { %635 = vmatmul.mubr.msk.f32.vlgmr.msra.gmra.mrb[2].mxu0 %vm69_vm2, %v159_v20  ;;  %v416_v20 = vld [vmem:[%s1088_s12] sm:$0x3] }
 0x22f   :  { %v238_v25 = vpop.f32.mrb[2].mxu0 }
 0x230   :  { %v239_v26 = vadd.f32 %v604_v24, %v238_v25  ;;  %v636_v27 = vpop.f32.mrb[3].mxu0  ;;  %v425_v24 = vsub.f32 1.0, %v416_v20 }
 0x232   :  { %v242_v28 = vmax.f32 %v239_v26, 0.0 }
 0x234   :  { %646 = vmatmul.mubr.msk.f32.vlgmr.msra.gmra.mrb[0].mxu1 %vm254_vm4, %v242_v28 }
 0x307   :  { %v324_v30 = vpop.f32.mrb[0].mxu1 }
 0x308   :  { %v930_v31 = vadd.f32 %v606_v29, %v324_v30  ;;  %v647_v32 = vpop.f32.mrb[1].mxu1  ;;  %v442_v29 = vsub.f32 1.0, %v437_v23 }
 0x30a   :  { %681 = vtanh.f32 %v930_v31  ;;  %v608_v33 = vmul.f32 -1.442695, %v930_v31 }
 0x30c   :  { %683 = vpow2.f32 %v608_v33 }
 0x314   :  { %v682_v34 = vpop.eup %681 }
 0x315   :  { %336 = vrot.lane.b32.xlu0 %v682_v34, %s757_s13 }
 0x316   :  { %v684_v35 = vpop.eup %683 }
 0x317   :  { %v332_v36 = vadd.f32 1.0, %v684_v35 }
 0x319   :  { %685 = vrcp.f32 %v332_v36 }
 0x323   :  { %v686_v37 = vpop.eup %685 }
 0x324   :  { %340 = vrot.lane.b32.xlu1 %v686_v37, %s757_s13  ;;  %348 = vrot.lane.b32.xlu0 %v686_v37, %s758_s14  ;;  %v426_v38 = vsub.f32 1.0, %v686_v37 }
 0x326   :  { %687 = vlog2.f32 %v426_v38 }
 0x327   :  { %689 = vlog2.f32 %v686_v37 }
 0x328   :  { %345 = vrot.lane.b32.xlu1 %v682_v34, %s758_s14 }
 0x330   :  { %v688_v47 = vpop.eup %687 }
 0x331   :  { %v428_v55 = vmul.f32 0.6931472, %v688_v47  ;;  %v690_v56 = vpop.eup %689 }
 0x332   :  { %v418_v59 = vmul.f32 0.6931472, %v690_v56 }
 0x333   :  { %v429_v57 = vmax.f32 %v428_v55, -100.0 }
 0x334   :  { %v419_v60 = vmax.f32 %v418_v59, -100.0 }
 0x387   :  { %v337_v40 = vpop.permute.xlu0 %336 }
 0x396   :  { %v341_v41 = vpop.permute.xlu1 %340  ;;  %v349_v44 = vpop.permute.xlu0 %348 }
 0x397   :  { %v938_v42 = vsel %vm343_vm5, %v337_v40, %v341_v41 }
 0x398   :  { %v354_v43 = vsub.f32 %v938_v42, %v352_v39  ;;  %v399_v52 = vsub.f32 %v938_v42, %v353_v48 }
 0x39a   :  { %v346_v45 = vpop.permute.xlu1 %345  ;;  %v360_v46 = vand.u32 2147483647, %v354_v43  ;;  %v404_v58 = vand.u32 2147483647, %v399_v52  ;;  %v355_v62 = vmul.f32 %v354_v43, %v354_v43  ;;  %v400_v3 = vmul.f32 %v399_v52, %v399_v52  ;;  %v497_v52 = vld [vmem:[%s1062_s8] sm:$0x3] }
 0x39b   :  { %v945_v49 = vsel %vm343_vm5, %v346_v45, %v349_v44 }
 0x39c   :  { %v370_v50 = vsub.f32 %v945_v49, %v353_v48  ;;  %v385_v51 = vsub.f32 %v945_v49, %v352_v39  ;;  %362 = vrot.lane.b32.xlu1 %v360_v46, %s759_s29  ;;  %v357_v1 = vsel %vm356_vm6, %v355_v62, 0.0  ;;  %v401_v4 = vsel %vm356_vm6, %v400_v3, 0.0 }
 0x39e   :  { %v390_v53 = vand.u32 2147483647, %v385_v51  ;;  %v375_v54 = vand.u32 2147483647, %v370_v50  ;;  %v371_v61 = vmul.f32 %v370_v50, %v370_v50  ;;  %v386_v0 = vmul.f32 %v385_v51, %v385_v51 }
 0x39f   :  { %v763_v51 = vmov 2  }
 0x3a0   :  { %392 = vrot.lane.b32.xlu1 %v390_v53, %s759_s29  ;;  %377 = vrot.lane.b32.xlu0 %v375_v54, %s759_s29  ;;  %v372_v63 = vsel %vm356_vm6, %v371_v61, 0.0  ;;  %v387_v2 = vsel %vm356_vm6, %v386_v0, 0.0 }
 0x3a1   :  { %680 = vset.pattern.permute.xlu1 %v763_v51  ;;  %679 = vset.pattern.permute.xlu0 %v763_v51 }
 0x3a4   :  { %431 = vrot.lane.b32.xlu1 %v429_v57, %s760_s30  ;;  %406 = vrot.lane.b32.xlu0 %v404_v58, %s759_s29 }
 0x3a8   :  { %421 = vrot.lane.b32.xlu0 %v419_v60, %s760_s30 }
 0x3c7   :  { %373 = vadd.xlane.f32.xlu0 %v372_v63 }
 0x3c8   :  { %358 = vadd.xlane.f32.xlu1 %v357_v1 }
 0x3cb   :  { %388 = vadd.xlane.f32.xlu0 %v387_v2 }
 0x3cf   :  { %402 = vadd.xlane.f32.xlu0 %v401_v4 }
 0x40e   :  { %v363_v5 = vpop.permute.xlu1 %362 }
 0x40f   :  { %v366_v6 = vsel %vm365_vm7, %v363_v5, 0.0  ;;  %v973_v5 = vld [vmem:[%s1063_s9] sm:$0x3] }
 0x410   :  { %367 = vadd.xlane.f32.xlu0 %v366_v6  ;;  %v498_v6 = vld [vmem:[%s1092_s2] sm:$0x3] }
 0x412   :  { %v378_v7 = vpop.permute.xlu0 %377  ;;  %v393_v9 = vpop.permute.xlu1 %392 }
 0x413   :  { %v380_v8 = vsel %vm365_vm7, %v378_v7, 0.0  ;;  %v395_v10 = vsel %vm365_vm7, %v393_v9, 0.0  ;;  %v514_v7 = vld [vmem:[%s1061_s7] sm:$0x3] }
 0x414   :  { %381 = vadd.xlane.f32.xlu1 %v380_v8 }
 0x416   :  { %v407_v11 = vpop.permute.xlu0 %406  ;;  %v432_v15 = vpop.permute.xlu1 %431 }
 0x417   :  { %v409_v12 = vsel %vm365_vm7, %v407_v11, 0.0  ;;  %v434_v34 = vmul.f32 %v432_v15, %v425_v24 }
 0x418   :  { %396 = vadd.xlane.f32.xlu1 %v395_v10 }
 0x41a   :  { %v422_v13 = vpop.permute.xlu0 %421 }
 0x41b   :  { %v424_v26 = vmul.f32 %v422_v13, %v416_v20  ;;  %v506_v13 = vmul.f32 %v498_v6, %v497_v52 }
 0x41c   :  { %410 = vadd.xlane.f32.xlu1 %v409_v12 }
 0x41d   :  { %v435_v38 = vadd.f32 %v434_v34, %v424_v26 }
 0x41f   :  { %v436_v46 = vsub.f32 0.0, %v435_v38 }
 0x426   :  { %443 = vrot.lane.b32.xlu0 %v429_v57, %s761_s4 }
 0x42d   :  { %438 = vrot.lane.b32.xlu1 %v419_v60, %s761_s4 }
 0x454   :  { %v374_v14 = vpop.xlane.xlu0 %373 }
 0x455   :  { %v359_v17 = vpop.xlane.xlu1 %358 }
 0x458   :  { %v389_v16 = vpop.xlane.xlu0 %388 }
 0x45c   :  { %v403_v18 = vpop.xlane.xlu0 %402 }
 0x49d   :  { %v368_v21 = vpop.xlane.xlu0 %367 }
 0x49e   :  { %v369_v28 = vadd.f32 %v368_v21, %v359_v17 }
 0x4a1   :  { %v382_v19 = vpop.xlane.xlu1 %381  ;;  %v444_v33 = vpop.permute.xlu0 %443 }
 0x4a2   :  { %v383_v25 = vadd.f32 %v382_v19, %v374_v14  ;;  %v446_v39 = vmul.f32 %v444_v33, %v442_v29  ;;  %v517_v14 = vmul.f32 %v514_v7, %v497_v52 }
 0x4a4   :  { %v384_v35 = vadd.f32 %v383_v25, %v369_v28 }
 0x4a5   :  { %v397_v22 = vpop.xlane.xlu1 %396 }
 0x4a6   :  { %v398_v30 = vadd.f32 %v397_v22, %v389_v16 }
 0x4a9   :  { %v411_v27 = vpop.xlane.xlu1 %410 }
 0x4aa   :  { %v412_v32 = vadd.f32 %v411_v27, %v403_v18 }
 0x4ac   :  { %v413_v36 = vadd.f32 %v412_v32, %v398_v30 }
 0x4ad   :  { %v439_v37 = vpop.permute.xlu1 %438 }
 0x4ae   :  { %vm956_vm9 = vcmp.lt.f32.partialorder %v413_v36, %v384_v35  ;;  %v441_v41 = vmul.f32 %v439_v37, %v437_v23 }
 0x4af   :  { %v415_v43 = vsel %vm956_vm9, %v413_v36, %v384_v35 }
 0x4b0   :  { %v447_v44 = vadd.f32 %v446_v39, %v441_v41  ;;  %v451_v45 = vsel %vm450_vm8, %v415_v43, 0.0 }
 0x4b1   :  { %452 = vadd.xlane.f32.xlu1 %v451_v45 }
 0x4b2   :  { %v448_v47 = vsub.f32 0.0, %v447_v44 }
 0x4b4   :  { %v449_v48 = vadd.f32 %v448_v47, %v436_v46 }
 0x4b6   :  { %v464_v50 = vsel %vm450_vm8, %v449_v48, 0.0 }
 0x4b7   :  { %465 = vadd.xlane.f32.xlu0 %v464_v50 }
 0x4cd   :  { %482 = vrot.lane.b32.xlu0 %v930_v31, %s762_s6 }
 0x4d1   :  { %501 = vperm.xlu0 %679, %v497_v52  }
 0x53e   :  { %v453_v53 = vpop.xlane.xlu1 %452 }
 0x53f   :  { %v454_v54 = vrot.slane %v453_v53, 4 }
 0x541   :  { %v455_v55 = vadd.f32 %v454_v54, %v453_v53 }
 0x543   :  { %v456_v56 = vrot.slane %v455_v55, 2 }
 0x544   :  { %v466_v57 = vpop.xlane.xlu0 %465 }
 0x545   :  { %v467_v58 = vrot.slane %v466_v57, 4  ;;  %v457_v59 = vadd.f32 %v456_v56, %v455_v55 }
 0x547   :  { %v468_v60 = vadd.f32 %v467_v58, %v466_v57  ;;  %v458_v61 = vrot.slane %v457_v59, 1 }
 0x548   :  { %v483_v62 = vpop.permute.xlu0 %482 }
 0x549   :  { %v469_v63 = vrot.slane %v468_v60, 2  ;;  %v485_v0 = vsel %vm956_vm9, %v930_v31, %v483_v62  ;;  %v459_v1 = vadd.f32 %v458_v61, %v457_v59 }
 0x54a   :  { %487 = vrot.lane.b32.xlu1 %v485_v0, %s764_s26 }
 0x54b   :  { %660 = vpush %v459_v1  ;;  %v470_v2 = vadd.f32 %v469_v63, %v468_v60 }
 0x54d   :  { %v471_v3 = vrot.slane %v470_v2, 1 }
 0x54e   :  { %492 = vrot.lane.b32.xlu1 %v930_v31, %s764_s26 }
 0x54f   :  { %v472_v4 = vadd.f32 %v471_v3, %v470_v2 }
 0x550   :  { %v502_v8 = vpop.permute.xlu0 %501 }
 0x551   :  { %662 = vpush %v472_v4  ;;  %v504_v9 = vmul.f32 %v502_v8, %v498_v6  ;;  %v515_v10 = vmul.f32 %v514_v7, %v502_v8 }
 0x552   :  { %525 = vperm.xlu1 %680, %v973_v5  }
 0x553   :  { %v505_v11 = vadd.f32 %v504_v9, %v497_v52  ;;  %v516_v12 = vadd.f32 %v515_v10, %v497_v52 }
 0x555   :  { %v507_v15 = vsel %vm343_vm5, %v505_v11, %v498_v6  ;;  %v518_v16 = vsel %vm343_vm5, %v516_v12, %v514_v7 }
 0x556   :  { %v509_v17 = vsel %vm508_vm10, %v507_v15, %v506_v13  ;;  %v519_v18 = vsel %vm508_vm10, %v518_v16, %v517_v14 }
 0x557   :  { %v511_v19 = vsel %vm510_vm11, %v509_v17, %v498_v6  ;;  %v520_v20 = vsel %vm510_vm11, %v519_v18, %v514_v7 }
 0x558   :  { %513 = vst.msk [vmem:[%s1072_s18] sm:$0x3] %vm512_vm12, %v511_v19  ;;  %521 = vst.msk [vmem:[%s1073_s19] sm:$0x3] %vm512_vm12, %v520_v20 }
 0x57c   :  { %s661_s29 = spop %660 }
 0x57d   :  { %s461_s30 = smul.f32 0.5, %s661_s29 }
 0x57f   :  { %463 = sst [smem:[#allocation7]] %s461_s30 }
 0x582   :  { %s663_s12 = spop %662 }
 0x583   :  { %s474_s1 = smul.f32 0.5, %s663_s12 }
 0x585   :  { %476 = sst [smem:[#allocation7 + $0x1]] %s474_s1 }
 0x586   :  { %702 = shalt.err (!%p699_p4)
}
 0x587   :  { %s765_s18 = smov [#allocation7]   ;;  %s766_s19 = smov [#allocation2]   ;;  %vm490_vm13 = vcmask 123904  }
 0x588   :  { %579 = dma.smem_to_vmem %s765_s18, 16, %s577_s23, [#allocation4]  }
 0x589   :  { %s548_s24 = sshll.u32 %s766_s19, 4  ;;  %s767_s22 = smov [#allocation5]   ;;  %s549_s24 = int_to_ptr.vmem [resolvable:$true] %s548_s24 }
 0x58a   :  { %s558_s6 = sshll.u32 %s767_s22, 4  ;;  %s703_s25 = scalar_lea.vmem %s549_s24, 32  ;;  %s559_s6 = int_to_ptr.vmem [resolvable:$true] %s558_s6 }
 0x58b   :  { %p704_p5 = scmp.ne.s32.totalorder %s549_s24, %s703_s25  ;;  %p708_p6 = scmp.lt.s32.totalorder %s549_s24, %s549_s24 }
 0x58c   :  { %p709_p7 = scmp.lt.s32.totalorder %s703_s25, %s703_s25 }
 0x58e   :  { %p710_p8 = por %p709_p7, %p708_p6 }
 0x590   :  { %p711_p9 = pnand %p710_p8, %p704_p5 }
 0x5bc   :  { %v488_v21 = vpop.permute.xlu1 %487 }
 0x5bd   :  { %491 = vst.msk [vmem:[#allocation2] sm:$0x3] %vm490_vm13, %v488_v21 }
 0x5be   :  { %714 = shalt.err (!%p711_p9)
}
 0x5bf   :  { %s715_s8 = scalar_lea.hbm %s1070_s16, 32 }
 0x5c0   :  { %p716_p10 = scmp.ne.s32.totalorder %s1070_s16, %s715_s8  ;;  %p719_p11 = scmp.lt.u32.totalorder %s715_s8, %s1070_s16 }
 0x5c2   :  { %p721_p12 = pnand %p719_p11, %p716_p10 }
 0x5c4   :  { %724 = shalt.err (!%p721_p12)
}
 0x5c5   :  { %551 = dma.vmem_to_hbm [thread:$0]  %s549_s24, 32, %s1070_s16, [#allocation3]   ;;  %v493_v22 = vpop.permute.xlu1 %492 }
 0x5c6   :  { %v495_v23 = vsel %vm956_vm9, %v930_v31, %v493_v22  ;;  %s725_s7 = scalar_lea.vmem %s559_s6, 32  ;;  %p730_p0 = scmp.lt.s32.totalorder %s559_s6, %s559_s6 }
 0x5c7   :  { %496 = vst.msk [vmem:[#allocation5] sm:$0x3] %vm490_vm13, %v495_v23  ;;  %p726_p13 = scmp.ne.s32.totalorder %s559_s6, %s725_s7  ;;  %p731_p1 = scmp.lt.s32.totalorder %s725_s7, %s725_s7 }
 0x5c9   :  { %p732_p2 = por %p731_p1, %p730_p0 }
 0x5cb   :  { %p733_p3 = pnand %p732_p2, %p726_p13 }
 0x5cd   :  { %736 = shalt.err (!%p733_p3)
}
 0x5ce   :  { %s737_s28 = scalar_lea.hbm %s1071_s17, 32 }
 0x5cf   :  { %p738_p4 = scmp.ne.s32.totalorder %s1071_s17, %s737_s28  ;;  %p741_p5 = scmp.lt.u32.totalorder %s737_s28, %s1071_s17 }
 0x5d1   :  { %p743_p6 = pnand %p741_p5, %p738_p4 }
 0x5d3   :  { %746 = shalt.err (!%p743_p6)
}
 0x5d4   :  { %561 = dma.vmem_to_hbm [thread:$0]  %s559_s6, 32, %s1071_s17, [#allocation6]   ;;  %v479_v31 = vsel %vm956_vm9, %v945_v49, %v938_v42  ;;  %v480_v24 = vsel %vm956_vm9, %v938_v42, %v945_v49  ;;  %v526_v25 = vpop.permute.xlu1 %525 }
 0x5d5   :  { %v528_v26 = vmul.f32 %v526_v25, %v479_v31  ;;  %v535_v27 = vmul.f32 %v526_v25, %v480_v24  ;;  %v530_v30 = vmul.f32 %v973_v5, %v479_v31  ;;  %v537_v32 = vmul.f32 %v973_v5, %v480_v24 }
 0x5d7   :  { %v529_v28 = vadd.f32 %v528_v26, %v973_v5  ;;  %v536_v29 = vadd.f32 %v535_v27, %v973_v5 }
 0x5d9   :  { %v531_v33 = vsel %vm343_vm5, %v529_v28, %v479_v31  ;;  %v538_v34 = vsel %vm343_vm5, %v536_v29, %v480_v24 }
 0x5da   :  { %v532_v35 = vsel %vm508_vm10, %v531_v33, %v530_v30  ;;  %v539_v36 = vsel %vm508_vm10, %v538_v34, %v537_v32 }
 0x5db   :  { %v533_v42 = vsel %vm510_vm11, %v532_v35, %v479_v31  ;;  %v540_v49 = vsel %vm510_vm11, %v539_v36, %v480_v24 }
 0x5dc   :  { %534 = vst.msk [vmem:[%s1074_s20] sm:$0x3] %vm512_vm12, %v533_v42  ;;  %541 = vst.msk [vmem:[%s1075_s21] sm:$0x3] %vm512_vm12, %v540_v49 }
 0x5dd   :  { %747 = dma.done.wait [#allocation3], 32  }
 0x5de   :  { %748 = vsyncadd [#allocation3], 4294967264 }
 0x5df   :  { %749 = dma.done.wait [#allocation6], 32  }
 0x5e0   :  { %750 = vsyncadd [#allocation6], 4294967264 }
 0x5e1   :  { %751 = dma.done.wait [#allocation4], 16  }
 0x5e2   :  { %752 = vsyncadd [#allocation4], 4294967280 }
 0x5e3   :  { %597 = sfence }
 0x5e4   :  { %598 = vsyncpa [#allocation3], 1 }
 0x5e5   :  { %599 = vsyncpa [#allocation6], 1 }
 0x5e6   :  { %600 = vsyncpa [#allocation4], 1 }

</bundles_post_ra>
